<compile_context>
chip_gen: v7x
topology: tpu7x:2x2x1
jax: 0.10.0
libtpu: 0.0.40
codegen_flags: <defaults>
</compile_context>

<pallas_src>
import math

import jax
import jax.numpy as jnp
from jax.experimental import pallas as pl
from jax.experimental.pallas import tpu as pltpu


# ----------------------------------------------------------------------------
# Fused forward kernel (one program per batch tile of B images).
#   x_ref  : (B, H+2, W, 3*C0)  bf16   zero-padded input, kw taps folded into C
#   w1_ref : (3, 3*C0, C1)      bf16   conv1 taps (kh-major, kw folded into K)
#   w2_ref : (9, C1, C2)        bf16   conv2 taps;   w3_ref : (9, C2, C3)
#   fw*_ref: fc weights bf16;   b*/fb*: f32 biases (1, C)
#   o_ref  : (1, B, 2)          f32    logits
#   pad2   : VMEM (B, H2+2, W2+2, C1)  pool1 output, zero-padded
#   pad3   : VMEM (B, H3+2, W3+2, C2)  pool2 output, zero-padded
#   hbuf1  : VMEM (H2, W, C1)          H-pooled conv1 rows (per image)
#   hbuf2  : VMEM (B, H3, W2, C2)      H-pooled conv2 rows (whole tile)
# ----------------------------------------------------------------------------
def network_kernel(x_ref, w1_ref, b1_ref, w2_ref, b2_ref, w3_ref, b3_ref,
                   fw1_ref, fb1_ref, fw2_ref, fb2_ref, o_ref,
                   pad2, pad3, hbuf1, hbuf2):
    f32 = jnp.float32
    bf16 = jnp.bfloat16

    B, Hp, W1, K1 = x_ref.shape
    H1 = Hp - 2
    C1 = w1_ref.shape[2]
    C2 = w2_ref.shape[2]
    C3 = w3_ref.shape[2]
    H2, W2 = H1 // 2, W1 // 2
    H3, W3 = H2 // 2, W2 // 2

    # ---- zero only the 1-pixel borders of the padded activation buffers ----
    # (interiors are fully overwritten below; scratch persists across grid
    #  steps and is per-core, so this runs every step -- it is cheap).
    def zero_border(buf, h, w, c):
        zr = jnp.zeros((B, 1, w + 2, c), f32)
        buf[:, 0:1, :, :] = zr
        buf[:, h + 1:h + 2, :, :] = zr
        zc = jnp.zeros((B, h, 1, c), f32)
        buf[:, 1:1 + h, 0:1, :] = zc
        buf[:, 1:1 + h, w + 1:w + 2, :] = zc

    zero_border(pad2, H2, W2, C1)
    zero_border(pad3, H3, W3, C2)

    # ---- conv1 (kw folded into K) + ReLU + fused 2x2 max-pool --------------
    b1 = b1_ref[...]                                        # (1, C1)
    for b in range(B):                                      # per image: M=H1*W1
        acc = jnp.zeros((H1 * W1, C1), f32)
        for kh in range(3):
            win = x_ref[b, kh:kh + H1, :, :]                # (H1, W1, 3*C0) bf16
            acc = acc + jnp.dot(win.reshape(H1 * W1, K1), w1_ref[kh],
                                preferred_element_type=f32)
        c1 = jnp.maximum(acc + b1, 0.0)                     # (H1*W1, C1) f32
        c1r = c1.reshape(H2, 2, W1, C1)                     # layout-trivial split
        hbuf1[...] = jnp.maximum(c1r[:, 0], c1r[:, 1])      # H-pool -> (H2,W1,C1)
        pooled1 = jnp.maximum(hbuf1[:, pl.ds(0, W2, 2), :], # W-pool via strided
                              hbuf1[:, pl.ds(1, W2, 2), :]) # reads -> (H2,W2,C1)
        pad2[b, 1:1 + H2, 1:1 + W2, :] = pooled1            # one dense store

    # ---- conv2 + ReLU + fused 2x2 max-pool (batch folded into M) -----------
    b2 = b2_ref[...]
    acc2 = jnp.zeros((B * H2 * W2, C2), f32)
    for kh in range(3):
        for kw in range(3):
            win = pad2[:, kh:kh + H2, kw:kw + W2, :]        # (B, H2, W2, C1)
            acc2 = acc2 + jnp.dot(
                win.reshape(B * H2 * W2, C1).astype(bf16), w2_ref[3 * kh + kw],
                preferred_element_type=f32)
    c2 = jnp.maximum(acc2 + b2, 0.0)                        # (B*H2*W2, C2)
    c2r = c2.reshape(B, H3, 2, W2, C2)
    hbuf2[...] = jnp.maximum(c2r[:, :, 0], c2r[:, :, 1])    # (B, H3, W2, C2)
    pooled2 = jnp.maximum(hbuf2[:, :, pl.ds(0, W3, 2), :],
                          hbuf2[:, :, pl.ds(1, W3, 2), :])  # (B, H3, W3, C2)
    pad3[:, 1:1 + H3, 1:1 + W3, :] = pooled2                # one dense store

    # ---- conv3 + ReLU at full M = B*H3*W3, fused global-average-pool -------
    b3 = b3_ref[...]
    acc3 = jnp.zeros((B * H3 * W3, C3), f32)
    for kh in range(3):
        for kw in range(3):
            win = pad3[:, kh:kh + H3, kw:kw + W3, :]        # (B, H3, W3, C2)
            acc3 = acc3 + jnp.dot(
                win.reshape(B * H3 * W3, C2).astype(bf16), w3_ref[3 * kh + kw],
                preferred_element_type=f32)
    c3 = jnp.maximum(acc3 + b3, 0.0)                        # (B*H3*W3, C3)
    gap = jnp.sum(c3.reshape(B, H3 * W3, C3), axis=1) * (1.0 / (H3 * W3))

    # ---- head: dropout (identity in eval) -> fc1 + ReLU -> fc2 -------------
    # TODO(synk): dropout(p=0.5) is the identity at inference; no RNG applied.
    h1 = jnp.maximum(
        jnp.dot(gap.astype(bf16), fw1_ref[...], preferred_element_type=f32)
        + fb1_ref[...], 0.0)                                # (B, F1)
    o_ref[0] = (jnp.dot(h1.astype(bf16), fw2_ref[...],
                        preferred_element_type=f32) + fb2_ref[...])   # (B, F2)


# ----------------------------------------------------------------------------
# Wrapper: single fused pallas_call over batch tiles.
# ----------------------------------------------------------------------------
def network_forward(params, x_nchw):
    x = x_nchw.astype(jnp.float32)                       # x = x.float()
    x = jnp.transpose(x, (0, 2, 3, 1))                   # NCHW -> NHWC glue
    N, H, W, C0 = x.shape
    assert H % 4 == 0 and W % 4 == 0, "two 2x2 max-pools need H, W % 4 == 0"

    # Zero-pad spatially, then fold conv1's kw taps into the channel dim
    # (wrapper glue: keeps in-kernel conv1 at 3 matmuls with K = 3*C0).
    xp = jnp.pad(x, ((0, 0), (1, 1), (1, 1), (0, 0)))     # (N, H+2, W+2, C0)
    xf = jnp.concatenate([xp[:, :, kw:kw + W, :] for kw in range(3)],
                         axis=-1).astype(jnp.bfloat16)    # (N, H+2, W, 3*C0)

    C1 = params["conv1_w"].shape[-1]
    C2 = params["conv2_w"].shape[-1]
    C3 = params["conv3_w"].shape[-1]
    F1 = params["fc1_w"].shape[-1]
    F2 = params["fc2_w"].shape[-1]
    H2, W2 = H // 2, W // 2
    H3, W3 = H2 // 2, W2 // 2

    # Batch tile per program: keep >=2 programs (megacore) and bound vregs/VMEM.
    B = max(1, min(4, N // 2)) if N >= 2 else 1
    G = pl.cdiv(N, B)
    if G * B != N:
        xf = jnp.pad(xf, ((0, G * B - N), (0, 0), (0, 0), (0, 0)))

    bf16 = jnp.bfloat16
    w1 = params["conv1_w"].reshape(3, 3 * C0, C1).astype(bf16)  # (kh, kw*C0, C1)
    w2 = params["conv2_w"].reshape(9, C1, C2).astype(bf16)
    w3 = params["conv3_w"].reshape(9, C2, C3).astype(bf16)
    fw1 = params["fc1_w"].astype(bf16)
    fw2 = params["fc2_w"].astype(bf16)
    b1 = params["conv1_b"].reshape(1, C1)
    b2 = params["conv2_b"].reshape(1, C2)
    b3 = params["conv3_b"].reshape(1, C3)
    fb1 = params["fc1_b"].reshape(1, F1)
    fb2 = params["fc2_b"].reshape(1, F2)

    def full(shape):  # whole-array block, resident across the grid
        return pl.BlockSpec(shape, lambda n: (0,) * len(shape))

    out = pl.pallas_call(
        network_kernel,
        out_shape=jax.ShapeDtypeStruct((G, B, F2), jnp.float32),
        grid=(G,),
        in_specs=[
            pl.BlockSpec((B, H + 2, W, 3 * C0), lambda n: (n, 0, 0, 0)),
            full((3, 3 * C0, C1)), full((1, C1)),
            full((9, C1, C2)), full((1, C2)),
            full((9, C2, C3)), full((1, C3)),
            full((C3, F1)), full((1, F1)),
            full((F1, F2)), full((1, F2)),
        ],
        out_specs=pl.BlockSpec((1, B, F2), lambda n: (n, 0, 0)),
        scratch_shapes=[
            pltpu.VMEM((B, H2 + 2, W2 + 2, C1), jnp.float32),  # pad2
            pltpu.VMEM((B, H3 + 2, W3 + 2, C2), jnp.float32),  # pad3
            pltpu.VMEM((H2, W, C1), jnp.float32),              # hbuf1 (per image)
            pltpu.VMEM((B, H3, W2, C2), jnp.float32),          # hbuf2
        ],
        compiler_params=pltpu.CompilerParams(
            dimension_semantics=("parallel",)),
    )(xf, w1, b1, w2, b2, w3, b3, fw1, fb1, fw2, fb2)
    return out.reshape(G * B, F2)[:N]


# ----------------------------------------------------------------------------
# Parameter init (mirrors the PyTorch module: Xavier-uniform weights,
# PyTorch-default uniform biases).
# ----------------------------------------------------------------------------
def _xavier_uniform(key, shape, fan_in, fan_out):
    bound = math.sqrt(6.0 / (fan_in + fan_out))
    return jax.random.uniform(key, shape, jnp.float32, -bound, bound)


def _bias_uniform(key, shape, fan_in):
    bound = 1.0 / math.sqrt(fan_in)
    return jax.random.uniform(key, shape, jnp.float32, -bound, bound)


def init_params(key):
    ks = jax.random.split(key, 10)
    params = {}
    conv_defs = [("conv1", 6, 32), ("conv2", 32, 64), ("conv3", 64, 128)]
    for i, (name, cin, cout) in enumerate(conv_defs):
        params[name + "_w"] = _xavier_uniform(ks[2 * i], (3, 3, cin, cout),
                                              fan_in=cin * 9, fan_out=cout * 9)
        params[name + "_b"] = _bias_uniform(ks[2 * i + 1], (cout,), cin * 9)
    params["fc1_w"] = _xavier_uniform(ks[6], (128, 64), 128, 64)
    params["fc1_b"] = _bias_uniform(ks[7], (64,), 128)
    params["fc2_w"] = _xavier_uniform(ks[8], (64, 2), 64, 2)
    params["fc2_b"] = _bias_uniform(ks[9], (2,), 64)
    return params


# ----------------------------------------------------------------------------
# Pure-JAX reference (f32, HIGHEST precision) for a numerical self-check.
# ----------------------------------------------------------------------------
def reference_forward(params, x_nchw):
    x = jnp.transpose(x_nchw.astype(jnp.float32), (0, 2, 3, 1))
    hp = jax.lax.Precision.HIGHEST

    def conv(x, w, b):
        y = jax.lax.conv_general_dilated(
            x, w, window_strides=(1, 1), padding="SAME",
            dimension_numbers=("NHWC", "HWIO", "NHWC"), precision=hp)
        return jax.nn.relu(y + b)

    def pool(x):
        return jax.lax.reduce_window(x, -jnp.inf, jax.lax.max,
                                     (1, 2, 2, 1), (1, 2, 2, 1), "VALID")

    x = pool(conv(x, params["conv1_w"], params["conv1_b"]))
    x = pool(conv(x, params["conv2_w"], params["conv2_b"]))
    x = conv(x, params["conv3_w"], params["conv3_b"])
    p = jnp.mean(x, axis=(1, 2))
    h = jax.nn.relu(jnp.dot(p, params["fc1_w"], precision=hp) + params["fc1_b"])
    return jnp.dot(h, params["fc2_w"], precision=hp) + params["fc2_b"]


if __name__ == "__main__":
    key = jax.random.PRNGKey(0)
    pkey, xkey = jax.random.split(key)
    params = init_params(pkey)
    # Input consistent with the module: batch=2, 6 channels, 16x16 spatial.
    x = jax.random.normal(xkey, (2, 6, 16, 16), dtype=jnp.float32)

    fwd = jax.jit(network_forward)
    out = fwd(params, x)
    jax.block_until_ready(out)
    assert out.shape == (2, 2) and out.dtype == jnp.float32
    assert bool(jnp.all(jnp.isfinite(out)))

    ref = reference_forward(params, x)
    # bf16 MXU operands (f32 accumulation) => allow ~1e-2-scale deviation.
    assert bool(jnp.allclose(out, ref, rtol=2e-2, atol=2e-2)), (
        f"mismatch: max|err|={float(jnp.max(jnp.abs(out - ref)))}")
    print("KERNEL_OK")
</pallas_src>

<mosaic_0001>
module attributes {stable_mosaic.version = 11 : i64} {
  func.func @network_kernel(%arg0: i32, %arg1: memref<1x18x16x18xbf16, #tpu.memory_space<vmem>>, %arg2: memref<3x18x32xbf16, #tpu.memory_space<vmem>>, %arg3: memref<1x32xf32, #tpu.memory_space<vmem>>, %arg4: memref<9x32x64xbf16, #tpu.memory_space<vmem>>, %arg5: memref<1x64xf32, #tpu.memory_space<vmem>>, %arg6: memref<9x64x128xbf16, #tpu.memory_space<vmem>>, %arg7: memref<1x128xf32, #tpu.memory_space<vmem>>, %arg8: memref<128x64xbf16, #tpu.memory_space<vmem>>, %arg9: memref<1x64xf32, #tpu.memory_space<vmem>>, %arg10: memref<64x2xbf16, #tpu.memory_space<vmem>>, %arg11: memref<1x2xf32, #tpu.memory_space<vmem>>, %arg12: memref<1x1x2xf32, #tpu.memory_space<vmem>>, %arg13: memref<1x10x10x32xf32, #tpu.memory_space<vmem>>, %arg14: memref<1x6x6x64xf32, #tpu.memory_space<vmem>>, %arg15: memref<8x16x32xf32, #tpu.memory_space<vmem>>, %arg16: memref<1x4x8x64xf32, #tpu.memory_space<vmem>>) attributes {dimension_semantics = [#tpu.dimension_semantics<parallel>], iteration_bounds = array<i64: 2>, scalar_prefetch = 0 : i64, scratch_operands = 4 : i64, tpu.core_type = #tpu.core_type<tc>, window_params = [{transform_indices = @transform_0, window_bounds = array<i64: 1, 18, 16, 18>}, {pipeline_mode = #tpu.pipeline_mode<synchronous>, transform_indices = @transform_1, window_bounds = array<i64: 3, 18, 32>}, {pipeline_mode = #tpu.pipeline_mode<synchronous>, transform_indices = @transform_2, window_bounds = array<i64: 1, 32>}, {pipeline_mode = #tpu.pipeline_mode<synchronous>, transform_indices = @transform_3, window_bounds = array<i64: 9, 32, 64>}, {pipeline_mode = #tpu.pipeline_mode<synchronous>, transform_indices = @transform_4, window_bounds = array<i64: 1, 64>}, {pipeline_mode = #tpu.pipeline_mode<synchronous>, transform_indices = @transform_5, window_bounds = array<i64: 9, 64, 128>}, {pipeline_mode = #tpu.pipeline_mode<synchronous>, transform_indices = @transform_6, window_bounds = array<i64: 1, 128>}, {pipeline_mode = #tpu.pipeline_mode<synchronous>, transform_indices = @transform_7, window_bounds = array<i64: 128, 64>}, {pipeline_mode = #tpu.pipeline_mode<synchronous>, transform_indices = @transform_8, window_bounds = array<i64: 1, 64>}, {pipeline_mode = #tpu.pipeline_mode<synchronous>, transform_indices = @transform_9, window_bounds = array<i64: 64, 2>}, {pipeline_mode = #tpu.pipeline_mode<synchronous>, transform_indices = @transform_10, window_bounds = array<i64: 1, 2>}, {transform_indices = @transform_11, window_bounds = array<i64: 1, 1, 2>}]} {
    %cst = arith.constant 0.000000e+00 : f32
    %0 = vector.broadcast %cst : f32 to vector<1x1x10x32xf32>
    %c0 = arith.constant 0 : index
    %c0_0 = arith.constant 0 : index
    %c0_1 = arith.constant 0 : index
    %c0_2 = arith.constant 0 : index
    %1 = vector.load %arg13[%c0, %c0_0, %c0_1, %c0_2] : memref<1x10x10x32xf32, #tpu.memory_space<vmem>>, vector<1x1x10x32xf32>
    tpu.vector_store %arg13[%c0, %c0_0, %c0_1, %c0_2], %0 {strides = array<i32>} : memref<1x10x10x32xf32, #tpu.memory_space<vmem>>, vector<1x1x10x32xf32>,
    %c0_3 = arith.constant 0 : index
    %c9 = arith.constant 9 : index
    %c0_4 = arith.constant 0 : index
    %c0_5 = arith.constant 0 : index
    %2 = vector.load %arg13[%c0_3, %c9, %c0_4, %c0_5] : memref<1x10x10x32xf32, #tpu.memory_space<vmem>>, vector<1x1x10x32xf32>
    tpu.vector_store %arg13[%c0_3, %c9, %c0_4, %c0_5], %0 {strides = array<i32>} : memref<1x10x10x32xf32, #tpu.memory_space<vmem>>, vector<1x1x10x32xf32>,
    %cst_6 = arith.constant 0.000000e+00 : f32
    %3 = vector.broadcast %cst_6 : f32 to vector<1x8x1x32xf32>
    %c0_7 = arith.constant 0 : index
    %c1 = arith.constant 1 : index
    %c0_8 = arith.constant 0 : index
    %c0_9 = arith.constant 0 : index
    %4 = vector.load %arg13[%c0_7, %c1, %c0_8, %c0_9] : memref<1x10x10x32xf32, #tpu.memory_space<vmem>>, vector<1x8x1x32xf32>
    tpu.vector_store %arg13[%c0_7, %c1, %c0_8, %c0_9], %3 {strides = array<i32>} : memref<1x10x10x32xf32, #tpu.memory_space<vmem>>, vector<1x8x1x32xf32>,
    %c0_10 = arith.constant 0 : index
    %c1_11 = arith.constant 1 : index
    %c9_12 = arith.constant 9 : index
    %c0_13 = arith.constant 0 : index
    %5 = vector.load %arg13[%c0_10, %c1_11, %c9_12, %c0_13] : memref<1x10x10x32xf32, #tpu.memory_space<vmem>>, vector<1x8x1x32xf32>
    tpu.vector_store %arg13[%c0_10, %c1_11, %c9_12, %c0_13], %3 {strides = array<i32>} : memref<1x10x10x32xf32, #tpu.memory_space<vmem>>, vector<1x8x1x32xf32>,
    %cst_14 = arith.constant 0.000000e+00 : f32
    %6 = vector.broadcast %cst_14 : f32 to vector<1x1x6x64xf32>
    %c0_15 = arith.constant 0 : index
    %c0_16 = arith.constant 0 : index
    %c0_17 = arith.constant 0 : index
    %c0_18 = arith.constant 0 : index
    %7 = vector.load %arg14[%c0_15, %c0_16, %c0_17, %c0_18] : memref<1x6x6x64xf32, #tpu.memory_space<vmem>>, vector<1x1x6x64xf32>
    tpu.vector_store %arg14[%c0_15, %c0_16, %c0_17, %c0_18], %6 {strides = array<i32>} : memref<1x6x6x64xf32, #tpu.memory_space<vmem>>, vector<1x1x6x64xf32>,
    %c0_19 = arith.constant 0 : index
    %c5 = arith.constant 5 : index
    %c0_20 = arith.constant 0 : index
    %c0_21 = arith.constant 0 : index
    %8 = vector.load %arg14[%c0_19, %c5, %c0_20, %c0_21] : memref<1x6x6x64xf32, #tpu.memory_space<vmem>>, vector<1x1x6x64xf32>
    tpu.vector_store %arg14[%c0_19, %c5, %c0_20, %c0_21], %6 {strides = array<i32>} : memref<1x6x6x64xf32, #tpu.memory_space<vmem>>, vector<1x1x6x64xf32>,
    %cst_22 = arith.constant 0.000000e+00 : f32
    %9 = vector.broadcast %cst_22 : f32 to vector<1x4x1x64xf32>
    %c0_23 = arith.constant 0 : index
    %c1_24 = arith.constant 1 : index
    %c0_25 = arith.constant 0 : index
    %c0_26 = arith.constant 0 : index
    %10 = vector.load %arg14[%c0_23, %c1_24, %c0_25, %c0_26] : memref<1x6x6x64xf32, #tpu.memory_space<vmem>>, vector<1x4x1x64xf32>
    tpu.vector_store %arg14[%c0_23, %c1_24, %c0_25, %c0_26], %9 {strides = array<i32>} : memref<1x6x6x64xf32, #tpu.memory_space<vmem>>, vector<1x4x1x64xf32>,
    %c0_27 = arith.constant 0 : index
    %c1_28 = arith.constant 1 : index
    %c5_29 = arith.constant 5 : index
    %c0_30 = arith.constant 0 : index
    %11 = vector.load %arg14[%c0_27, %c1_28, %c5_29, %c0_30] : memref<1x6x6x64xf32, #tpu.memory_space<vmem>>, vector<1x4x1x64xf32>
    tpu.vector_store %arg14[%c0_27, %c1_28, %c5_29, %c0_30], %9 {strides = array<i32>} : memref<1x6x6x64xf32, #tpu.memory_space<vmem>>, vector<1x4x1x64xf32>,
    %c0_31 = arith.constant 0 : index
    %c0_32 = arith.constant 0 : index
    %12 = vector.load %arg3[%c0_31, %c0_32] : memref<1x32xf32, #tpu.memory_space<vmem>>, vector<1x32xf32>
    %cst_33 = arith.constant 0.000000e+00 : f32
    %13 = vector.broadcast %cst_33 : f32 to vector<256x32xf32>
    %c0_34 = arith.constant 0 : index
    %c0_35 = arith.constant 0 : index
    %c0_36 = arith.constant 0 : index
    %c0_37 = arith.constant 0 : index
    %14 = vector.load %arg1[%c0_34, %c0_35, %c0_36, %c0_37] : memref<1x18x16x18xbf16, #tpu.memory_space<vmem>>, vector<1x16x16x18xbf16>
    %15 = vector.shape_cast %14 : vector<1x16x16x18xbf16> to vector<16x16x18xbf16>
    %16 = vector.shape_cast %15 : vector<16x16x18xbf16> to vector<256x18xbf16>
    %c0_38 = arith.constant 0 : index
    %c0_39 = arith.constant 0 : index
    %c0_40 = arith.constant 0 : index
    %17 = vector.load %arg2[%c0_38, %c0_39, %c0_40] : memref<3x18x32xbf16, #tpu.memory_space<vmem>>, vector<1x18x32xbf16>
    %18 = vector.shape_cast %17 : vector<1x18x32xbf16> to vector<18x32xbf16>
    %cst_41 = arith.constant dense<0.000000e+00> : vector<256x32xf32>
    %19 = tpu.matmul %16, %18, %cst_41 {dimension_numbers = #tpu.dot_dimension_numbers<[1], [0], [0], [1], [0, 0, 1, 1], [], []>} : vector<256x18xbf16>, vector<18x32xbf16>, vector<256x32xf32> -> vector<256x32xf32>
    %20 = arith.addf %13, %19 : vector<256x32xf32>
    %c0_42 = arith.constant 0 : index
    %c1_43 = arith.constant 1 : index
    %c0_44 = arith.constant 0 : index
    %c0_45 = arith.constant 0 : index
    %21 = vector.load %arg1[%c0_42, %c1_43, %c0_44, %c0_45] : memref<1x18x16x18xbf16, #tpu.memory_space<vmem>>, vector<1x16x16x18xbf16>
    %22 = vector.shape_cast %21 : vector<1x16x16x18xbf16> to vector<16x16x18xbf16>
    %23 = vector.shape_cast %22 : vector<16x16x18xbf16> to vector<256x18xbf16>
    %c1_46 = arith.constant 1 : index
    %c0_47 = arith.constant 0 : index
    %c0_48 = arith.constant 0 : index
    %24 = vector.load %arg2[%c1_46, %c0_47, %c0_48] : memref<3x18x32xbf16, #tpu.memory_space<vmem>>, vector<1x18x32xbf16>
    %25 = vector.shape_cast %24 : vector<1x18x32xbf16> to vector<18x32xbf16>
    %cst_49 = arith.constant dense<0.000000e+00> : vector<256x32xf32>
    %26 = tpu.matmul %23, %25, %cst_49 {dimension_numbers = #tpu.dot_dimension_numbers<[1], [0], [0], [1], [0, 0, 1, 1], [], []>} : vector<256x18xbf16>, vector<18x32xbf16>, vector<256x32xf32> -> vector<256x32xf32>
    %27 = arith.addf %20, %26 : vector<256x32xf32>
    %c0_50 = arith.constant 0 : index
    %c2 = arith.constant 2 : index
    %c0_51 = arith.constant 0 : index
    %c0_52 = arith.constant 0 : index
    %28 = vector.load %arg1[%c0_50, %c2, %c0_51, %c0_52] : memref<1x18x16x18xbf16, #tpu.memory_space<vmem>>, vector<1x16x16x18xbf16>
    %29 = vector.shape_cast %28 : vector<1x16x16x18xbf16> to vector<16x16x18xbf16>
    %30 = vector.shape_cast %29 : vector<16x16x18xbf16> to vector<256x18xbf16>
    %c2_53 = arith.constant 2 : index
    %c0_54 = arith.constant 0 : index
    %c0_55 = arith.constant 0 : index
    %31 = vector.load %arg2[%c2_53, %c0_54, %c0_55] : memref<3x18x32xbf16, #tpu.memory_space<vmem>>, vector<1x18x32xbf16>
    %32 = vector.shape_cast %31 : vector<1x18x32xbf16> to vector<18x32xbf16>
    %cst_56 = arith.constant dense<0.000000e+00> : vector<256x32xf32>
    %33 = tpu.matmul %30, %32, %cst_56 {dimension_numbers = #tpu.dot_dimension_numbers<[1], [0], [0], [1], [0, 0, 1, 1], [], []>} : vector<256x18xbf16>, vector<18x32xbf16>, vector<256x32xf32> -> vector<256x32xf32>
    %34 = arith.addf %27, %33 : vector<256x32xf32>
    %35 = vector.broadcast %12 : vector<1x32xf32> to vector<256x32xf32>
    %36 = arith.addf %34, %35 : vector<256x32xf32>
    %cst_57 = arith.constant 0.000000e+00 : f32
    %37 = vector.broadcast %cst_57 : f32 to vector<256x32xf32>
    %38 = arith.maximumf %36, %37 : vector<256x32xf32>
    %39 = vector.shape_cast %38 : vector<256x32xf32> to vector<8x2x16x32xf32>
    %40 = vector.extract_strided_slice %39 {offsets = [0, 0, 0, 0], sizes = [8, 1, 16, 32], strides = [1, 1, 1, 1]} : vector<8x2x16x32xf32> to vector<8x1x16x32xf32>
    %41 = vector.shape_cast %40 : vector<8x1x16x32xf32> to vector<8x16x32xf32>
    %42 = vector.extract_strided_slice %39 {offsets = [0, 1, 0, 0], sizes = [8, 1, 16, 32], strides = [1, 1, 1, 1]} : vector<8x2x16x32xf32> to vector<8x1x16x32xf32>
    %43 = vector.shape_cast %42 : vector<8x1x16x32xf32> to vector<8x16x32xf32>
    %44 = arith.maximumf %41, %43 : vector<8x16x32xf32>
    %c0_58 = arith.constant 0 : index
    %c0_59 = arith.constant 0 : index
    %c0_60 = arith.constant 0 : index
    %45 = vector.load %arg15[%c0_58, %c0_59, %c0_60] : memref<8x16x32xf32, #tpu.memory_space<vmem>>, vector<8x16x32xf32>
    tpu.vector_store %arg15[%c0_58, %c0_59, %c0_60], %44 {strides = array<i32>} : memref<8x16x32xf32, #tpu.memory_space<vmem>>, vector<8x16x32xf32>,
    %c0_61 = arith.constant 0 : index
    %c0_62 = arith.constant 0 : index
    %c0_63 = arith.constant 0 : index
    %46 = tpu.strided_load %arg15[%c0_61, %c0_62, %c0_63] {strides = array<i32: 1, 2, 1>} : memref<8x16x32xf32, #tpu.memory_space<vmem>>, vector<8x8x32xf32>
    %c0_64 = arith.constant 0 : index
    %c1_65 = arith.constant 1 : index
    %c0_66 = arith.constant 0 : index
    %47 = tpu.strided_load %arg15[%c0_64, %c1_65, %c0_66] {strides = array<i32: 1, 2, 1>} : memref<8x16x32xf32, #tpu.memory_space<vmem>>, vector<8x8x32xf32>
    %48 = arith.maximumf %46, %47 : vector<8x8x32xf32>
    %c0_67 = arith.constant 0 : index
    %c1_68 = arith.constant 1 : index
    %c1_69 = arith.constant 1 : index
    %c0_70 = arith.constant 0 : index
    %49 = vector.load %arg13[%c0_67, %c1_68, %c1_69, %c0_70] : memref<1x10x10x32xf32, #tpu.memory_space<vmem>>, vector<1x8x8x32xf32>
    %50 = vector.shape_cast %49 : vector<1x8x8x32xf32> to vector<8x8x32xf32>
    %51 = vector.shape_cast %48 : vector<8x8x32xf32> to vector<1x8x8x32xf32>
    tpu.vector_store %arg13[%c0_67, %c1_68, %c1_69, %c0_70], %51 {strides = array<i32>} : memref<1x10x10x32xf32, #tpu.memory_space<vmem>>, vector<1x8x8x32xf32>,
    %c0_71 = arith.constant 0 : index
    %c0_72 = arith.constant 0 : index
    %52 = vector.load %arg5[%c0_71, %c0_72] : memref<1x64xf32, #tpu.memory_space<vmem>>, vector<1x64xf32>
    %cst_73 = arith.constant 0.000000e+00 : f32
    %53 = vector.broadcast %cst_73 : f32 to vector<64x64xf32>
    %c0_74 = arith.constant 0 : index
    %c0_75 = arith.constant 0 : index
    %c0_76 = arith.constant 0 : index
    %c0_77 = arith.constant 0 : index
    %54 = vector.load %arg13[%c0_74, %c0_75, %c0_76, %c0_77] : memref<1x10x10x32xf32, #tpu.memory_space<vmem>>, vector<1x8x8x32xf32>
    %55 = vector.shape_cast %54 : vector<1x8x8x32xf32> to vector<64x32xf32>
    %56 = arith.truncf %55 : vector<64x32xf32> to vector<64x32xbf16>
    %c0_78 = arith.constant 0 : index
    %c0_79 = arith.constant 0 : index
    %c0_80 = arith.constant 0 : index
    %57 = vector.load %arg4[%c0_78, %c0_79, %c0_80] : memref<9x32x64xbf16, #tpu.memory_space<vmem>>, vector<1x32x64xbf16>
    %58 = vector.shape_cast %57 : vector<1x32x64xbf16> to vector<32x64xbf16>
    %cst_81 = arith.constant dense<0.000000e+00> : vector<64x64xf32>
    %59 = tpu.matmul %56, %58, %cst_81 {dimension_numbers = #tpu.dot_dimension_numbers<[1], [0], [0], [1], [0, 0, 1, 1], [], []>} : vector<64x32xbf16>, vector<32x64xbf16>, vector<64x64xf32> -> vector<64x64xf32>
    %60 = arith.addf %53, %59 : vector<64x64xf32>
    %c0_82 = arith.constant 0 : index
    %c0_83 = arith.constant 0 : index
    %c1_84 = arith.constant 1 : index
    %c0_85 = arith.constant 0 : index
    %61 = vector.load %arg13[%c0_82, %c0_83, %c1_84, %c0_85] : memref<1x10x10x32xf32, #tpu.memory_space<vmem>>, vector<1x8x8x32xf32>
    %62 = vector.shape_cast %61 : vector<1x8x8x32xf32> to vector<64x32xf32>
    %63 = arith.truncf %62 : vector<64x32xf32> to vector<64x32xbf16>
    %c1_86 = arith.constant 1 : index
    %c0_87 = arith.constant 0 : index
    %c0_88 = arith.constant 0 : index
    %64 = vector.load %arg4[%c1_86, %c0_87, %c0_88] : memref<9x32x64xbf16, #tpu.memory_space<vmem>>, vector<1x32x64xbf16>
    %65 = vector.shape_cast %64 : vector<1x32x64xbf16> to vector<32x64xbf16>
    %cst_89 = arith.constant dense<0.000000e+00> : vector<64x64xf32>
    %66 = tpu.matmul %63, %65, %cst_89 {dimension_numbers = #tpu.dot_dimension_numbers<[1], [0], [0], [1], [0, 0, 1, 1], [], []>} : vector<64x32xbf16>, vector<32x64xbf16>, vector<64x64xf32> -> vector<64x64xf32>
    %67 = arith.addf %60, %66 : vector<64x64xf32>
    %c0_90 = arith.constant 0 : index
    %c0_91 = arith.constant 0 : index
    %c2_92 = arith.constant 2 : index
    %c0_93 = arith.constant 0 : index
    %68 = vector.load %arg13[%c0_90, %c0_91, %c2_92, %c0_93] : memref<1x10x10x32xf32, #tpu.memory_space<vmem>>, vector<1x8x8x32xf32>
    %69 = vector.shape_cast %68 : vector<1x8x8x32xf32> to vector<64x32xf32>
    %70 = arith.truncf %69 : vector<64x32xf32> to vector<64x32xbf16>
    %c2_94 = arith.constant 2 : index
    %c0_95 = arith.constant 0 : index
    %c0_96 = arith.constant 0 : index
    %71 = vector.load %arg4[%c2_94, %c0_95, %c0_96] : memref<9x32x64xbf16, #tpu.memory_space<vmem>>, vector<1x32x64xbf16>
    %72 = vector.shape_cast %71 : vector<1x32x64xbf16> to vector<32x64xbf16>
    %cst_97 = arith.constant dense<0.000000e+00> : vector<64x64xf32>
    %73 = tpu.matmul %70, %72, %cst_97 {dimension_numbers = #tpu.dot_dimension_numbers<[1], [0], [0], [1], [0, 0, 1, 1], [], []>} : vector<64x32xbf16>, vector<32x64xbf16>, vector<64x64xf32> -> vector<64x64xf32>
    %74 = arith.addf %67, %73 : vector<64x64xf32>
    %c0_98 = arith.constant 0 : index
    %c1_99 = arith.constant 1 : index
    %c0_100 = arith.constant 0 : index
    %c0_101 = arith.constant 0 : index
    %75 = vector.load %arg13[%c0_98, %c1_99, %c0_100, %c0_101] : memref<1x10x10x32xf32, #tpu.memory_space<vmem>>, vector<1x8x8x32xf32>
    %76 = vector.shape_cast %75 : vector<1x8x8x32xf32> to vector<64x32xf32>
    %77 = arith.truncf %76 : vector<64x32xf32> to vector<64x32xbf16>
    %c3 = arith.constant 3 : index
    %c0_102 = arith.constant 0 : index
    %c0_103 = arith.constant 0 : index
    %78 = vector.load %arg4[%c3, %c0_102, %c0_103] : memref<9x32x64xbf16, #tpu.memory_space<vmem>>, vector<1x32x64xbf16>
    %79 = vector.shape_cast %78 : vector<1x32x64xbf16> to vector<32x64xbf16>
    %cst_104 = arith.constant dense<0.000000e+00> : vector<64x64xf32>
    %80 = tpu.matmul %77, %79, %cst_104 {dimension_numbers = #tpu.dot_dimension_numbers<[1], [0], [0], [1], [0, 0, 1, 1], [], []>} : vector<64x32xbf16>, vector<32x64xbf16>, vector<64x64xf32> -> vector<64x64xf32>
    %81 = arith.addf %74, %80 : vector<64x64xf32>
    %c0_105 = arith.constant 0 : index
    %c1_106 = arith.constant 1 : index
    %c1_107 = arith.constant 1 : index
    %c0_108 = arith.constant 0 : index
    %82 = vector.load %arg13[%c0_105, %c1_106, %c1_107, %c0_108] : memref<1x10x10x32xf32, #tpu.memory_space<vmem>>, vector<1x8x8x32xf32>
    %83 = vector.shape_cast %82 : vector<1x8x8x32xf32> to vector<64x32xf32>
    %84 = arith.truncf %83 : vector<64x32xf32> to vector<64x32xbf16>
    %c4 = arith.constant 4 : index
    %c0_109 = arith.constant 0 : index
    %c0_110 = arith.constant 0 : index
    %85 = vector.load %arg4[%c4, %c0_109, %c0_110] : memref<9x32x64xbf16, #tpu.memory_space<vmem>>, vector<1x32x64xbf16>
    %86 = vector.shape_cast %85 : vector<1x32x64xbf16> to vector<32x64xbf16>
    %cst_111 = arith.constant dense<0.000000e+00> : vector<64x64xf32>
    %87 = tpu.matmul %84, %86, %cst_111 {dimension_numbers = #tpu.dot_dimension_numbers<[1], [0], [0], [1], [0, 0, 1, 1], [], []>} : vector<64x32xbf16>, vector<32x64xbf16>, vector<64x64xf32> -> vector<64x64xf32>
    %88 = arith.addf %81, %87 : vector<64x64xf32>
    %c0_112 = arith.constant 0 : index
    %c1_113 = arith.constant 1 : index
    %c2_114 = arith.constant 2 : index
    %c0_115 = arith.constant 0 : index
    %89 = vector.load %arg13[%c0_112, %c1_113, %c2_114, %c0_115] : memref<1x10x10x32xf32, #tpu.memory_space<vmem>>, vector<1x8x8x32xf32>
    %90 = vector.shape_cast %89 : vector<1x8x8x32xf32> to vector<64x32xf32>
    %91 = arith.truncf %90 : vector<64x32xf32> to vector<64x32xbf16>
    %c5_116 = arith.constant 5 : index
    %c0_117 = arith.constant 0 : index
    %c0_118 = arith.constant 0 : index
    %92 = vector.load %arg4[%c5_116, %c0_117, %c0_118] : memref<9x32x64xbf16, #tpu.memory_space<vmem>>, vector<1x32x64xbf16>
    %93 = vector.shape_cast %92 : vector<1x32x64xbf16> to vector<32x64xbf16>
    %cst_119 = arith.constant dense<0.000000e+00> : vector<64x64xf32>
    %94 = tpu.matmul %91, %93, %cst_119 {dimension_numbers = #tpu.dot_dimension_numbers<[1], [0], [0], [1], [0, 0, 1, 1], [], []>} : vector<64x32xbf16>, vector<32x64xbf16>, vector<64x64xf32> -> vector<64x64xf32>
    %95 = arith.addf %88, %94 : vector<64x64xf32>
    %c0_120 = arith.constant 0 : index
    %c2_121 = arith.constant 2 : index
    %c0_122 = arith.constant 0 : index
    %c0_123 = arith.constant 0 : index
    %96 = vector.load %arg13[%c0_120, %c2_121, %c0_122, %c0_123] : memref<1x10x10x32xf32, #tpu.memory_space<vmem>>, vector<1x8x8x32xf32>
    %97 = vector.shape_cast %96 : vector<1x8x8x32xf32> to vector<64x32xf32>
    %98 = arith.truncf %97 : vector<64x32xf32> to vector<64x32xbf16>
    %c6 = arith.constant 6 : index
    %c0_124 = arith.constant 0 : index
    %c0_125 = arith.constant 0 : index
    %99 = vector.load %arg4[%c6, %c0_124, %c0_125] : memref<9x32x64xbf16, #tpu.memory_space<vmem>>, vector<1x32x64xbf16>
    %100 = vector.shape_cast %99 : vector<1x32x64xbf16> to vector<32x64xbf16>
    %cst_126 = arith.constant dense<0.000000e+00> : vector<64x64xf32>
    %101 = tpu.matmul %98, %100, %cst_126 {dimension_numbers = #tpu.dot_dimension_numbers<[1], [0], [0], [1], [0, 0, 1, 1], [], []>} : vector<64x32xbf16>, vector<32x64xbf16>, vector<64x64xf32> -> vector<64x64xf32>
    %102 = arith.addf %95, %101 : vector<64x64xf32>
    %c0_127 = arith.constant 0 : index
    %c2_128 = arith.constant 2 : index
    %c1_129 = arith.constant 1 : index
    %c0_130 = arith.constant 0 : index
    %103 = vector.load %arg13[%c0_127, %c2_128, %c1_129, %c0_130] : memref<1x10x10x32xf32, #tpu.memory_space<vmem>>, vector<1x8x8x32xf32>
    %104 = vector.shape_cast %103 : vector<1x8x8x32xf32> to vector<64x32xf32>
    %105 = arith.truncf %104 : vector<64x32xf32> to vector<64x32xbf16>
    %c7 = arith.constant 7 : index
    %c0_131 = arith.constant 0 : index
    %c0_132 = arith.constant 0 : index
    %106 = vector.load %arg4[%c7, %c0_131, %c0_132] : memref<9x32x64xbf16, #tpu.memory_space<vmem>>, vector<1x32x64xbf16>
    %107 = vector.shape_cast %106 : vector<1x32x64xbf16> to vector<32x64xbf16>
    %cst_133 = arith.constant dense<0.000000e+00> : vector<64x64xf32>
    %108 = tpu.matmul %105, %107, %cst_133 {dimension_numbers = #tpu.dot_dimension_numbers<[1], [0], [0], [1], [0, 0, 1, 1], [], []>} : vector<64x32xbf16>, vector<32x64xbf16>, vector<64x64xf32> -> vector<64x64xf32>
    %109 = arith.addf %102, %108 : vector<64x64xf32>
    %c0_134 = arith.constant 0 : index
    %c2_135 = arith.constant 2 : index
    %c2_136 = arith.constant 2 : index
    %c0_137 = arith.constant 0 : index
    %110 = vector.load %arg13[%c0_134, %c2_135, %c2_136, %c0_137] : memref<1x10x10x32xf32, #tpu.memory_space<vmem>>, vector<1x8x8x32xf32>
    %111 = vector.shape_cast %110 : vector<1x8x8x32xf32> to vector<64x32xf32>
    %112 = arith.truncf %111 : vector<64x32xf32> to vector<64x32xbf16>
    %c8 = arith.constant 8 : index
    %c0_138 = arith.constant 0 : index
    %c0_139 = arith.constant 0 : index
    %113 = vector.load %arg4[%c8, %c0_138, %c0_139] : memref<9x32x64xbf16, #tpu.memory_space<vmem>>, vector<1x32x64xbf16>
    %114 = vector.shape_cast %113 : vector<1x32x64xbf16> to vector<32x64xbf16>
    %cst_140 = arith.constant dense<0.000000e+00> : vector<64x64xf32>
    %115 = tpu.matmul %112, %114, %cst_140 {dimension_numbers = #tpu.dot_dimension_numbers<[1], [0], [0], [1], [0, 0, 1, 1], [], []>} : vector<64x32xbf16>, vector<32x64xbf16>, vector<64x64xf32> -> vector<64x64xf32>
    %116 = arith.addf %109, %115 : vector<64x64xf32>
    %117 = vector.broadcast %52 : vector<1x64xf32> to vector<64x64xf32>
    %118 = arith.addf %116, %117 : vector<64x64xf32>
    %cst_141 = arith.constant 0.000000e+00 : f32
    %119 = vector.broadcast %cst_141 : f32 to vector<64x64xf32>
    %120 = arith.maximumf %118, %119 : vector<64x64xf32>
    %121 = vector.shape_cast %120 : vector<64x64xf32> to vector<1x4x2x8x64xf32>
    %122 = vector.extract_strided_slice %121 {offsets = [0, 0, 0, 0, 0], sizes = [1, 4, 1, 8, 64], strides = [1, 1, 1, 1, 1]} : vector<1x4x2x8x64xf32> to vector<1x4x1x8x64xf32>
    %123 = vector.shape_cast %122 : vector<1x4x1x8x64xf32> to vector<1x4x8x64xf32>
    %124 = vector.extract_strided_slice %121 {offsets = [0, 0, 1, 0, 0], sizes = [1, 4, 1, 8, 64], strides = [1, 1, 1, 1, 1]} : vector<1x4x2x8x64xf32> to vector<1x4x1x8x64xf32>
    %125 = vector.shape_cast %124 : vector<1x4x1x8x64xf32> to vector<1x4x8x64xf32>
    %126 = arith.maximumf %123, %125 : vector<1x4x8x64xf32>
    %c0_142 = arith.constant 0 : index
    %c0_143 = arith.constant 0 : index
    %c0_144 = arith.constant 0 : index
    %c0_145 = arith.constant 0 : index
    %127 = vector.load %arg16[%c0_142, %c0_143, %c0_144, %c0_145] : memref<1x4x8x64xf32, #tpu.memory_space<vmem>>, vector<1x4x8x64xf32>
    tpu.vector_store %arg16[%c0_142, %c0_143, %c0_144, %c0_145], %126 {strides = array<i32>} : memref<1x4x8x64xf32, #tpu.memory_space<vmem>>, vector<1x4x8x64xf32>,
    %c0_146 = arith.constant 0 : index
    %c0_147 = arith.constant 0 : index
    %c0_148 = arith.constant 0 : index
    %c0_149 = arith.constant 0 : index
    %128 = tpu.strided_load %arg16[%c0_146, %c0_147, %c0_148, %c0_149] {strides = array<i32: 1, 1, 2, 1>} : memref<1x4x8x64xf32, #tpu.memory_space<vmem>>, vector<1x4x4x64xf32>
    %c0_150 = arith.constant 0 : index
    %c0_151 = arith.constant 0 : index
    %c1_152 = arith.constant 1 : index
    %c0_153 = arith.constant 0 : index
    %129 = tpu.strided_load %arg16[%c0_150, %c0_151, %c1_152, %c0_153] {strides = array<i32: 1, 1, 2, 1>} : memref<1x4x8x64xf32, #tpu.memory_space<vmem>>, vector<1x4x4x64xf32>
    %130 = arith.maximumf %128, %129 : vector<1x4x4x64xf32>
    %c0_154 = arith.constant 0 : index
    %c1_155 = arith.constant 1 : index
    %c1_156 = arith.constant 1 : index
    %c0_157 = arith.constant 0 : index
    %131 = vector.load %arg14[%c0_154, %c1_155, %c1_156, %c0_157] : memref<1x6x6x64xf32, #tpu.memory_space<vmem>>, vector<1x4x4x64xf32>
    tpu.vector_store %arg14[%c0_154, %c1_155, %c1_156, %c0_157], %130 {strides = array<i32>} : memref<1x6x6x64xf32, #tpu.memory_space<vmem>>, vector<1x4x4x64xf32>,
    %c0_158 = arith.constant 0 : index
    %c0_159 = arith.constant 0 : index
    %132 = vector.load %arg7[%c0_158, %c0_159] : memref<1x128xf32, #tpu.memory_space<vmem>>, vector<1x128xf32>
    %cst_160 = arith.constant 0.000000e+00 : f32
    %133 = vector.broadcast %cst_160 : f32 to vector<16x128xf32>
    %c0_161 = arith.constant 0 : index
    %c0_162 = arith.constant 0 : index
    %c0_163 = arith.constant 0 : index
    %c0_164 = arith.constant 0 : index
    %134 = vector.load %arg14[%c0_161, %c0_162, %c0_163, %c0_164] : memref<1x6x6x64xf32, #tpu.memory_space<vmem>>, vector<1x4x4x64xf32>
    %135 = vector.shape_cast %134 : vector<1x4x4x64xf32> to vector<16x64xf32>
    %136 = arith.truncf %135 : vector<16x64xf32> to vector<16x64xbf16>
    %c0_165 = arith.constant 0 : index
    %c0_166 = arith.constant 0 : index
    %c0_167 = arith.constant 0 : index
    %137 = vector.load %arg6[%c0_165, %c0_166, %c0_167] : memref<9x64x128xbf16, #tpu.memory_space<vmem>>, vector<1x64x128xbf16>
    %138 = vector.shape_cast %137 : vector<1x64x128xbf16> to vector<64x128xbf16>
    %cst_168 = arith.constant dense<0.000000e+00> : vector<16x128xf32>
    %139 = tpu.matmul %136, %138, %cst_168 {dimension_numbers = #tpu.dot_dimension_numbers<[1], [0], [0], [1], [0, 0, 1, 1], [], []>} : vector<16x64xbf16>, vector<64x128xbf16>, vector<16x128xf32> -> vector<16x128xf32>
    %140 = arith.addf %133, %139 : vector<16x128xf32>
    %c0_169 = arith.constant 0 : index
    %c0_170 = arith.constant 0 : index
    %c1_171 = arith.constant 1 : index
    %c0_172 = arith.constant 0 : index
    %141 = vector.load %arg14[%c0_169, %c0_170, %c1_171, %c0_172] : memref<1x6x6x64xf32, #tpu.memory_space<vmem>>, vector<1x4x4x64xf32>
    %142 = vector.shape_cast %141 : vector<1x4x4x64xf32> to vector<16x64xf32>
    %143 = arith.truncf %142 : vector<16x64xf32> to vector<16x64xbf16>
    %c1_173 = arith.constant 1 : index
    %c0_174 = arith.constant 0 : index
    %c0_175 = arith.constant 0 : index
    %144 = vector.load %arg6[%c1_173, %c0_174, %c0_175] : memref<9x64x128xbf16, #tpu.memory_space<vmem>>, vector<1x64x128xbf16>
    %145 = vector.shape_cast %144 : vector<1x64x128xbf16> to vector<64x128xbf16>
    %cst_176 = arith.constant dense<0.000000e+00> : vector<16x128xf32>
    %146 = tpu.matmul %143, %145, %cst_176 {dimension_numbers = #tpu.dot_dimension_numbers<[1], [0], [0], [1], [0, 0, 1, 1], [], []>} : vector<16x64xbf16>, vector<64x128xbf16>, vector<16x128xf32> -> vector<16x128xf32>
    %147 = arith.addf %140, %146 : vector<16x128xf32>
    %c0_177 = arith.constant 0 : index
    %c0_178 = arith.constant 0 : index
    %c2_179 = arith.constant 2 : index
    %c0_180 = arith.constant 0 : index
    %148 = vector.load %arg14[%c0_177, %c0_178, %c2_179, %c0_180] : memref<1x6x6x64xf32, #tpu.memory_space<vmem>>, vector<1x4x4x64xf32>
    %149 = vector.shape_cast %148 : vector<1x4x4x64xf32> to vector<16x64xf32>
    %150 = arith.truncf %149 : vector<16x64xf32> to vector<16x64xbf16>
    %c2_181 = arith.constant 2 : index
    %c0_182 = arith.constant 0 : index
    %c0_183 = arith.constant 0 : index
    %151 = vector.load %arg6[%c2_181, %c0_182, %c0_183] : memref<9x64x128xbf16, #tpu.memory_space<vmem>>, vector<1x64x128xbf16>
    %152 = vector.shape_cast %151 : vector<1x64x128xbf16> to vector<64x128xbf16>
    %cst_184 = arith.constant dense<0.000000e+00> : vector<16x128xf32>
    %153 = tpu.matmul %150, %152, %cst_184 {dimension_numbers = #tpu.dot_dimension_numbers<[1], [0], [0], [1], [0, 0, 1, 1], [], []>} : vector<16x64xbf16>, vector<64x128xbf16>, vector<16x128xf32> -> vector<16x128xf32>
    %154 = arith.addf %147, %153 : vector<16x128xf32>
    %c0_185 = arith.constant 0 : index
    %c1_186 = arith.constant 1 : index
    %c0_187 = arith.constant 0 : index
    %c0_188 = arith.constant 0 : index
    %155 = vector.load %arg14[%c0_185, %c1_186, %c0_187, %c0_188] : memref<1x6x6x64xf32, #tpu.memory_space<vmem>>, vector<1x4x4x64xf32>
    %156 = vector.shape_cast %155 : vector<1x4x4x64xf32> to vector<16x64xf32>
    %157 = arith.truncf %156 : vector<16x64xf32> to vector<16x64xbf16>
    %c3_189 = arith.constant 3 : index
    %c0_190 = arith.constant 0 : index
    %c0_191 = arith.constant 0 : index
    %158 = vector.load %arg6[%c3_189, %c0_190, %c0_191] : memref<9x64x128xbf16, #tpu.memory_space<vmem>>, vector<1x64x128xbf16>
    %159 = vector.shape_cast %158 : vector<1x64x128xbf16> to vector<64x128xbf16>
    %cst_192 = arith.constant dense<0.000000e+00> : vector<16x128xf32>
    %160 = tpu.matmul %157, %159, %cst_192 {dimension_numbers = #tpu.dot_dimension_numbers<[1], [0], [0], [1], [0, 0, 1, 1], [], []>} : vector<16x64xbf16>, vector<64x128xbf16>, vector<16x128xf32> -> vector<16x128xf32>
    %161 = arith.addf %154, %160 : vector<16x128xf32>
    %c0_193 = arith.constant 0 : index
    %c1_194 = arith.constant 1 : index
    %c1_195 = arith.constant 1 : index
    %c0_196 = arith.constant 0 : index
    %162 = vector.load %arg14[%c0_193, %c1_194, %c1_195, %c0_196] : memref<1x6x6x64xf32, #tpu.memory_space<vmem>>, vector<1x4x4x64xf32>
    %163 = vector.shape_cast %162 : vector<1x4x4x64xf32> to vector<16x64xf32>
    %164 = arith.truncf %163 : vector<16x64xf32> to vector<16x64xbf16>
    %c4_197 = arith.constant 4 : index
    %c0_198 = arith.constant 0 : index
    %c0_199 = arith.constant 0 : index
    %165 = vector.load %arg6[%c4_197, %c0_198, %c0_199] : memref<9x64x128xbf16, #tpu.memory_space<vmem>>, vector<1x64x128xbf16>
    %166 = vector.shape_cast %165 : vector<1x64x128xbf16> to vector<64x128xbf16>
    %cst_200 = arith.constant dense<0.000000e+00> : vector<16x128xf32>
    %167 = tpu.matmul %164, %166, %cst_200 {dimension_numbers = #tpu.dot_dimension_numbers<[1], [0], [0], [1], [0, 0, 1, 1], [], []>} : vector<16x64xbf16>, vector<64x128xbf16>, vector<16x128xf32> -> vector<16x128xf32>
    %168 = arith.addf %161, %167 : vector<16x128xf32>
    %c0_201 = arith.constant 0 : index
    %c1_202 = arith.constant 1 : index
    %c2_203 = arith.constant 2 : index
    %c0_204 = arith.constant 0 : index
    %169 = vector.load %arg14[%c0_201, %c1_202, %c2_203, %c0_204] : memref<1x6x6x64xf32, #tpu.memory_space<vmem>>, vector<1x4x4x64xf32>
    %170 = vector.shape_cast %169 : vector<1x4x4x64xf32> to vector<16x64xf32>
    %171 = arith.truncf %170 : vector<16x64xf32> to vector<16x64xbf16>
    %c5_205 = arith.constant 5 : index
    %c0_206 = arith.constant 0 : index
    %c0_207 = arith.constant 0 : index
    %172 = vector.load %arg6[%c5_205, %c0_206, %c0_207] : memref<9x64x128xbf16, #tpu.memory_space<vmem>>, vector<1x64x128xbf16>
    %173 = vector.shape_cast %172 : vector<1x64x128xbf16> to vector<64x128xbf16>
    %cst_208 = arith.constant dense<0.000000e+00> : vector<16x128xf32>
    %174 = tpu.matmul %171, %173, %cst_208 {dimension_numbers = #tpu.dot_dimension_numbers<[1], [0], [0], [1], [0, 0, 1, 1], [], []>} : vector<16x64xbf16>, vector<64x128xbf16>, vector<16x128xf32> -> vector<16x128xf32>
    %175 = arith.addf %168, %174 : vector<16x128xf32>
    %c0_209 = arith.constant 0 : index
    %c2_210 = arith.constant 2 : index
    %c0_211 = arith.constant 0 : index
    %c0_212 = arith.constant 0 : index
    %176 = vector.load %arg14[%c0_209, %c2_210, %c0_211, %c0_212] : memref<1x6x6x64xf32, #tpu.memory_space<vmem>>, vector<1x4x4x64xf32>
    %177 = vector.shape_cast %176 : vector<1x4x4x64xf32> to vector<16x64xf32>
    %178 = arith.truncf %177 : vector<16x64xf32> to vector<16x64xbf16>
    %c6_213 = arith.constant 6 : index
    %c0_214 = arith.constant 0 : index
    %c0_215 = arith.constant 0 : index
    %179 = vector.load %arg6[%c6_213, %c0_214, %c0_215] : memref<9x64x128xbf16, #tpu.memory_space<vmem>>, vector<1x64x128xbf16>
    %180 = vector.shape_cast %179 : vector<1x64x128xbf16> to vector<64x128xbf16>
    %cst_216 = arith.constant dense<0.000000e+00> : vector<16x128xf32>
    %181 = tpu.matmul %178, %180, %cst_216 {dimension_numbers = #tpu.dot_dimension_numbers<[1], [0], [0], [1], [0, 0, 1, 1], [], []>} : vector<16x64xbf16>, vector<64x128xbf16>, vector<16x128xf32> -> vector<16x128xf32>
    %182 = arith.addf %175, %181 : vector<16x128xf32>
    %c0_217 = arith.constant 0 : index
    %c2_218 = arith.constant 2 : index
    %c1_219 = arith.constant 1 : index
    %c0_220 = arith.constant 0 : index
    %183 = vector.load %arg14[%c0_217, %c2_218, %c1_219, %c0_220] : memref<1x6x6x64xf32, #tpu.memory_space<vmem>>, vector<1x4x4x64xf32>
    %184 = vector.shape_cast %183 : vector<1x4x4x64xf32> to vector<16x64xf32>
    %185 = arith.truncf %184 : vector<16x64xf32> to vector<16x64xbf16>
    %c7_221 = arith.constant 7 : index
    %c0_222 = arith.constant 0 : index
    %c0_223 = arith.constant 0 : index
    %186 = vector.load %arg6[%c7_221, %c0_222, %c0_223] : memref<9x64x128xbf16, #tpu.memory_space<vmem>>, vector<1x64x128xbf16>
    %187 = vector.shape_cast %186 : vector<1x64x128xbf16> to vector<64x128xbf16>
    %cst_224 = arith.constant dense<0.000000e+00> : vector<16x128xf32>
    %188 = tpu.matmul %185, %187, %cst_224 {dimension_numbers = #tpu.dot_dimension_numbers<[1], [0], [0], [1], [0, 0, 1, 1], [], []>} : vector<16x64xbf16>, vector<64x128xbf16>, vector<16x128xf32> -> vector<16x128xf32>
    %189 = arith.addf %182, %188 : vector<16x128xf32>
    %c0_225 = arith.constant 0 : index
    %c2_226 = arith.constant 2 : index
    %c2_227 = arith.constant 2 : index
    %c0_228 = arith.constant 0 : index
    %190 = vector.load %arg14[%c0_225, %c2_226, %c2_227, %c0_228] : memref<1x6x6x64xf32, #tpu.memory_space<vmem>>, vector<1x4x4x64xf32>
    %191 = vector.shape_cast %190 : vector<1x4x4x64xf32> to vector<16x64xf32>
    %192 = arith.truncf %191 : vector<16x64xf32> to vector<16x64xbf16>
    %c8_229 = arith.constant 8 : index
    %c0_230 = arith.constant 0 : index
    %c0_231 = arith.constant 0 : index
    %193 = vector.load %arg6[%c8_229, %c0_230, %c0_231] : memref<9x64x128xbf16, #tpu.memory_space<vmem>>, vector<1x64x128xbf16>
    %194 = vector.shape_cast %193 : vector<1x64x128xbf16> to vector<64x128xbf16>
    %cst_232 = arith.constant dense<0.000000e+00> : vector<16x128xf32>
    %195 = tpu.matmul %192, %194, %cst_232 {dimension_numbers = #tpu.dot_dimension_numbers<[1], [0], [0], [1], [0, 0, 1, 1], [], []>} : vector<16x64xbf16>, vector<64x128xbf16>, vector<16x128xf32> -> vector<16x128xf32>
    %196 = arith.addf %189, %195 : vector<16x128xf32>
    %197 = vector.broadcast %132 : vector<1x128xf32> to vector<16x128xf32>
    %198 = arith.addf %196, %197 : vector<16x128xf32>
    %cst_233 = arith.constant 0.000000e+00 : f32
    %199 = vector.broadcast %cst_233 : f32 to vector<16x128xf32>
    %200 = arith.maximumf %198, %199 : vector<16x128xf32>
    %201 = vector.shape_cast %200 : vector<16x128xf32> to vector<1x16x128xf32>
    %cst_234 = arith.constant dense<0.000000e+00> : vector<1x128xf32>
    %202 = vector.multi_reduction <add>, %201, %cst_234 [1] : vector<1x16x128xf32> to vector<1x128xf32>
    %cst_235 = arith.constant 6.250000e-02 : f32
    %203 = vector.broadcast %cst_235 : f32 to vector<1x128xf32>
    %204 = arith.mulf %202, %203 : vector<1x128xf32>
    %205 = arith.truncf %204 : vector<1x128xf32> to vector<1x128xbf16>
    %c0_236 = arith.constant 0 : index
    %c0_237 = arith.constant 0 : index
    %206 = vector.load %arg8[%c0_236, %c0_237] : memref<128x64xbf16, #tpu.memory_space<vmem>>, vector<128x64xbf16>
    %cst_238 = arith.constant dense<0.000000e+00> : vector<1x64xf32>
    %207 = tpu.matmul %205, %206, %cst_238 {dimension_numbers = #tpu.dot_dimension_numbers<[1], [0], [0], [1], [0, 0, 1, 1], [], []>} : vector<1x128xbf16>, vector<128x64xbf16>, vector<1x64xf32> -> vector<1x64xf32>
    %c0_239 = arith.constant 0 : index
    %c0_240 = arith.constant 0 : index
    %208 = vector.load %arg9[%c0_239, %c0_240] : memref<1x64xf32, #tpu.memory_space<vmem>>, vector<1x64xf32>
    %209 = arith.addf %207, %208 : vector<1x64xf32>
    %cst_241 = arith.constant 0.000000e+00 : f32
    %210 = vector.broadcast %cst_241 : f32 to vector<1x64xf32>
    %211 = arith.maximumf %209, %210 : vector<1x64xf32>
    %212 = arith.truncf %211 : vector<1x64xf32> to vector<1x64xbf16>
    %c0_242 = arith.constant 0 : index
    %c0_243 = arith.constant 0 : index
    %213 = vector.load %arg10[%c0_242, %c0_243] : memref<64x2xbf16, #tpu.memory_space<vmem>>, vector<64x2xbf16>
    %cst_244 = arith.constant dense<0.000000e+00> : vector<1x2xf32>
    %214 = tpu.matmul %212, %213, %cst_244 {dimension_numbers = #tpu.dot_dimension_numbers<[1], [0], [0], [1], [0, 0, 1, 1], [], []>} : vector<1x64xbf16>, vector<64x2xbf16>, vector<1x2xf32> -> vector<1x2xf32>
    %c0_245 = arith.constant 0 : index
    %c0_246 = arith.constant 0 : index
    %215 = vector.load %arg11[%c0_245, %c0_246] : memref<1x2xf32, #tpu.memory_space<vmem>>, vector<1x2xf32>
    %216 = arith.addf %214, %215 : vector<1x2xf32>
    %c0_247 = arith.constant 0 : index
    %c0_248 = arith.constant 0 : index
    %c0_249 = arith.constant 0 : index
    %217 = vector.load %arg12[%c0_247, %c0_248, %c0_249] : memref<1x1x2xf32, #tpu.memory_space<vmem>>, vector<1x1x2xf32>
    %218 = vector.shape_cast %217 : vector<1x1x2xf32> to vector<1x2xf32>
    %219 = vector.shape_cast %216 : vector<1x2xf32> to vector<1x1x2xf32>
    tpu.vector_store %arg12[%c0_247, %c0_248, %c0_249], %219 {strides = array<i32>} : memref<1x1x2xf32, #tpu.memory_space<vmem>>, vector<1x1x2xf32>,
    return
  }
  func.func @transform_0(%arg0: i32) -> (i32, i32, i32, i32) {
    %c0_i32 = arith.constant 0 : i32
    %c0_i32_0 = arith.constant 0 : i32
    %c0_i32_1 = arith.constant 0 : i32
    %c0_i32_2 = arith.constant 0 : i32
    return %arg0, %c0_i32, %c0_i32_0, %c0_i32_1 : i32, i32, i32, i32
  }
  func.func @transform_1(%arg0: i32) -> (i32, i32, i32) {
    %c0_i32 = arith.constant 0 : i32
    %c0_i32_0 = arith.constant 0 : i32
    %c0_i32_1 = arith.constant 0 : i32
    %c0_i32_2 = arith.constant 0 : i32
    return %c0_i32, %c0_i32_0, %c0_i32_1 : i32, i32, i32
  }
  func.func @transform_2(%arg0: i32) -> (i32, i32) {
    %c0_i32 = arith.constant 0 : i32
    %c0_i32_0 = arith.constant 0 : i32
    %c0_i32_1 = arith.constant 0 : i32
    return %c0_i32, %c0_i32_0 : i32, i32
  }
  func.func @transform_3(%arg0: i32) -> (i32, i32, i32) {
    %c0_i32 = arith.constant 0 : i32
    %c0_i32_0 = arith.constant 0 : i32
    %c0_i32_1 = arith.constant 0 : i32
    %c0_i32_2 = arith.constant 0 : i32
    return %c0_i32, %c0_i32_0, %c0_i32_1 : i32, i32, i32
  }
  func.func @transform_4(%arg0: i32) -> (i32, i32) {
    %c0_i32 = arith.constant 0 : i32
    %c0_i32_0 = arith.constant 0 : i32
    %c0_i32_1 = arith.constant 0 : i32
    return %c0_i32, %c0_i32_0 : i32, i32
  }
  func.func @transform_5(%arg0: i32) -> (i32, i32, i32) {
    %c0_i32 = arith.constant 0 : i32
    %c0_i32_0 = arith.constant 0 : i32
    %c0_i32_1 = arith.constant 0 : i32
    %c0_i32_2 = arith.constant 0 : i32
    return %c0_i32, %c0_i32_0, %c0_i32_1 : i32, i32, i32
  }
  func.func @transform_6(%arg0: i32) -> (i32, i32) {
    %c0_i32 = arith.constant 0 : i32
    %c0_i32_0 = arith.constant 0 : i32
    %c0_i32_1 = arith.constant 0 : i32
    return %c0_i32, %c0_i32_0 : i32, i32
  }
  func.func @transform_7(%arg0: i32) -> (i32, i32) {
    %c0_i32 = arith.constant 0 : i32
    %c0_i32_0 = arith.constant 0 : i32
    %c0_i32_1 = arith.constant 0 : i32
    return %c0_i32, %c0_i32_0 : i32, i32
  }
  func.func @transform_8(%arg0: i32) -> (i32, i32) {
    %c0_i32 = arith.constant 0 : i32
    %c0_i32_0 = arith.constant 0 : i32
    %c0_i32_1 = arith.constant 0 : i32
    return %c0_i32, %c0_i32_0 : i32, i32
  }
  func.func @transform_9(%arg0: i32) -> (i32, i32) {
    %c0_i32 = arith.constant 0 : i32
    %c0_i32_0 = arith.constant 0 : i32
    %c0_i32_1 = arith.constant 0 : i32
    return %c0_i32, %c0_i32_0 : i32, i32
  }
  func.func @transform_10(%arg0: i32) -> (i32, i32) {
    %c0_i32 = arith.constant 0 : i32
    %c0_i32_0 = arith.constant 0 : i32
    %c0_i32_1 = arith.constant 0 : i32
    return %c0_i32, %c0_i32_0 : i32, i32
  }
  func.func @transform_11(%arg0: i32) -> (i32, i32, i32) {
    %c0_i32 = arith.constant 0 : i32
    %c0_i32_0 = arith.constant 0 : i32
    %c0_i32_1 = arith.constant 0 : i32
    return %arg0, %c0_i32, %c0_i32_0 : i32, i32, i32
  }
}

</mosaic_0001>

<bundles_post_ra>
// kernel: network_forward.1
= control target key start
LH: loop header
LB: loop body
LE: loop exit
PB: predicated region body
PF: predicated region fallthrough
CT: control target
= control target key end

     0   :  { %16 = vsyncpa [#allocation7], 0  ;;  %s5896_s0 = inlined_call_operand.vmem [shape: bf16[2,18,16,18], index: 0, kind: input, shape index: {}]   ;;  %s5897_s1 = inlined_call_operand.vmem [shape: bf16[3,18,32], index: 1, kind: input, shape index: {}]   ;;  %s5898_s2 = inlined_call_operand.vmem [shape: f32[1,32], index: 2, kind: input, shape index: {}]   ;;  %s5899_s3 = inlined_call_operand.vmem [shape: bf16[9,32,64], index: 3, kind: input, shape index: {}]   ;;  %s5900_s4 = inlined_call_operand.vmem [shape: f32[1,64], index: 4, kind: input, shape index: {}]   ;;  %s5901_s5 = inlined_call_operand.vmem [shape: bf16[9,64,128], index: 5, kind: input, shape index: {}]   ;;  %s5902_s6 = inlined_call_operand.vmem [shape: f32[1,128], index: 6, kind: input, shape index: {}]   ;;  %s5903_s7 = inlined_call_operand.vmem [shape: bf16[128,64], index: 7, kind: input, shape index: {}]   ;;  %s5904_s8 = inlined_call_operand.vmem [shape: f32[1,64], index: 8, kind: input, shape index: {}]   ;;  %s5905_s9 = inlined_call_operand.vmem [shape: bf16[64,2], index: 9, kind: input, shape index: {}]   ;;  %s5906_s10 = inlined_call_operand.vmem [shape: f32[1,2], index: 10, kind: input, shape index: {}]   ;;  %s5907_s11 = inlined_call_operand.hbm [shape: f32[2,1,2], index: 11, kind: output, shape index: {}]  }
   0x1   :  { %18 = vsyncpa [#allocation7 + $0x1], 0  ;;  %s5140_s17 = smov 0   ;;  %s5142_s18 = smov 0  }
   0x2   :  { %s5144_s19 = smov 0   ;;  %s5146_s20 = smov 0  }
   0x3 LB: > { %s5161_s21 = sadd.s32 4294967295, %s5075_s20   ;;  %s3783_s22 = sadd.s32 4294967294, %s5075_s20   ;;  %s5075_s20 = sphi %s5146_s20, %s5913_s20   ;;  %s5071_s19 = sphi %s5144_s19, %s5912_s19   ;;  %s5067_s18 = sphi %s5142_s18, %s5911_s18   ;;  %s5063_s17 = sphi %s5140_s17, %s5910_s17  }
   0x4   : > { %s5165_s23 = sadd.s32 1, %s5075_s20   ;;  %s267_s24 = sadd.s32 1, %s5071_s19 }
   0x5   : > { %s264_s25 = ssub.s32 %s5075_s20, %s5165_s23  ;;  %p277_p0 = scmp.ne.s32.totalorder %s5071_s19, %s5067_s18 }
   0x6   : > { %p265_p1 = scmp.eq.s32.totalorder %s264_s25, 0  ;;  %p278_p2 = scmp.eq.s32.totalorder %s5161_s21, 1 }
   0x7   : > { %p283_p3 = scmp.ne.s32.totalorder %s5067_s18, %s5063_s17  ;;  %p284_p4 = scmp.eq.s32.totalorder %s3783_s22, 1 }
   0x8   : > { %s5176_s26 = scalar_select %p265_p1, %s5071_s19, %s267_s24  }
   0x9   : > { %p5178_p5 = por %p278_p2, %p277_p0  ;;  %p5182_p6 = por %p284_p4, %p283_p3 }
   0xa   : > { %p3786_p7 = scmp.ge.s32.totalorder %s5075_s20, 1  ;;  %p340_p8 = scmp.lt.s32.totalorder %s5075_s20, 3 }
   0xc   : > { %p341_p9 = pnand %p3786_p7, %p340_p8 }
   0xd   : > { %v4875_v0 = vld [vmem:[%s5897_s1 + $0xc] sm:$0xff] (!%p341_p9)   ;;  %vm635_vm0 = vcmask (!%p341_p9), 1040384   ;;  %v4876_v1 = vld [vmem:[%s5897_s1 + $0x14] ss:$0 sps:$4 sm:$0x11] (!%p341_p9)   ;;  %p379_p10 = scmp.lt.s32.totalorder (!%p341_p9), %s5161_s21, 1 }
   0xe   : > { %344 = sbr.rel (%p341_p9) target bundleno = 1571 (0x623), region = 64  ;;  %4341 = vmatprep.subr.bf16.mxu0 (!%p341_p9), %v4875_v0  ;;  %4697 = vmatprep.subr.bf16.mxu1 (!%p341_p9), %v4875_v0  ;;  %v637_v2 = vsel (!%p341_p9), %vm635_vm0, %v4876_v1, 0  ;;  %v4879_v3 = vld [vmem:[%s5897_s1] sm:$0xff] (!%p341_p9)   ;;  %vm586_vm1 = vcmask (!%p341_p9), 146432   ;;  %v4895_v9 = vld [vmem:[%s5897_s1 + $0x18] sm:$0xff] (!%p341_p9)   ;;  %vm385_vm2 = vcmask (!%p341_p9), 261120  }
   0xf   : > { %4342 = vmatpush3.bf16.msra.mxu0 (!%p341_p9), %v4875_v0  ;;  %4699 = vmatpush3.bf16.msra.mxu1 (!%p341_p9), %v4875_v0  ;;  %v4886_v4 = vld [vmem:[%s5897_s1 + $0x8] ss:$0 sps:$4 sm:$0x11] (!%p341_p9)   ;;  %v4904_v22 = vld [vmem:[%s5897_s1 + $0x20] ss:$0 sps:$4 sm:$0x11] (!%p341_p9)  }
  0x10   : > { %4829 = vmatprep.subr.msk.bf16.mxu0 (!%p341_p9), %vm635_vm0, %v4876_v1  ;;  %4830 = vmatprep.subr.msk.bf16.mxu1 (!%p341_p9), %vm635_vm0, %v4876_v1  ;;  %v938_v8 = vsel (!%p341_p9), %vm635_vm0, %v4886_v4, 0  ;;  %v1276_v25 = vsel (!%p341_p9), %vm635_vm0, %v4904_v22, 0  ;;  %vm387_vm3 = vcmask (!%p341_p9), 254976   ;;  %vm393_vm4 = vcmask (!%p341_p9), 253952   ;;  %v4929_v58 = vld [vmem:[%s5899_s3 + $0x10] sm:$0xff] (!%p341_p9)   ;;  %v4930_v59 = vld [vmem:[%s5899_s3 + $0x18] sm:$0xff] (!%p341_p9)  }
  0x11   : > { %v5077_v57 = vmov (!%p341_p9), 0.0   ;;  %v5372_v0 = vld [vmem:[%s5899_s3] sm:$0xff] (!%p341_p9)   ;;  %vm415_vm5 = vcmask (!%p341_p9), 516096   ;;  %vm410_vm6 = vcmask (!%p341_p9), 521216   ;;  %vm5078_vm7 = vmmov (!%p341_p9), 0   ;;  %s5079_s24 = smov (!%p341_p9), [#allocation6]  }
  0x12   : > { %386 = vst.msk [vmem:[#allocation2] sm:$0xff] (!%p341_p9), %vm385_vm2, %v5077_v57  ;;  %390 = vst.msk [vmem:[#allocation2 + $0x90] sm:$0xff] (!%p341_p9), %vm385_vm2, %v5077_v57  ;;  %v5378_v1 = vld [vmem:[%s5898_s2] ss:$0 sm:$0xff] (!%p341_p9)  ;;  %vm2657_vm8 = vcmask (!%p341_p9), 523264   ;;  %vm2681_vm9 = vcmask (!%p341_p9), 519168  }
  0x13   : > { %4344 = vmatpush3.bf16.msra.mxu0 (!%p341_p9), %v637_v2  ;;  %4700 = vmatpush3.bf16.msra.mxu1 (!%p341_p9), %v637_v2  ;;  %388 = vst.msk [vmem:[#allocation2 + $0x8] sm:$0x3] (!%p341_p9), %vm387_vm3, %v5077_v57  ;;  %391 = vst.msk [vmem:[#allocation2 + $0x98] sm:$0x3] (!%p341_p9), %vm387_vm3, %v5077_v57  ;;  %vm3713_vm10 = vcmask (!%p341_p9), 8192   ;;  %s5017_s25 = sshll.u32 (!%p341_p9), %s5079_s24, 4  ;;  %s5018_s25 = int_to_ptr.vmem [resolvable:$false] %s5017_s25 }
  0x14   : > { %4377 = vmatprep.subr.bf16.mxu0 (!%p341_p9), %v4879_v3  ;;  %394 = vst.msk [vmem:[#allocation2 + $0x10] sm:$0x1] (!%p341_p9), %vm393_vm4, %v5077_v57  ;;  %395 = vst.msk [vmem:[#allocation2 + $0x20] sm:$0x1] (!%p341_p9), %vm393_vm4, %v5077_v57  ;;  %4449 = vmatprep.subr.bf16.mxu1 (!%p341_p9), %v4929_v58  ;;  %s5019_s13 = scalar_lea.vmem (!%p341_p9), %s5018_s25, 32 }
  0x15   : > { %s380_s14 = scalar_select %p379_p10, %s5161_s21, 1  ;;  %396 = vst.msk [vmem:[#allocation2 + $0x30] sm:$0x1] %vm393_vm4, %v5077_v57  ;;  %397 = vst.msk [vmem:[#allocation2 + $0x40] sm:$0x1] %vm393_vm4, %v5077_v57 }
  0x16   : > { %398 = vst.msk [vmem:[#allocation2 + $0x50] sm:$0x1] %vm393_vm4, %v5077_v57  ;;  %399 = vst.msk [vmem:[#allocation2 + $0x60] sm:$0x1] %vm393_vm4, %v5077_v57 }
  0x17   : > { %s4833_s22 = smul.u32 144, %s380_s14  ;;  %400 = vst.msk [vmem:[#allocation2 + $0x70] sm:$0x1] %vm393_vm4, %v5077_v57  ;;  %401 = vst.msk [vmem:[#allocation2 + $0x80] sm:$0x1] %vm393_vm4, %v5077_v57 }
  0x18   : > { %402 = vst.msk [vmem:[#allocation2 + $0x19] sm:$0x1] %vm393_vm4, %v5077_v57  ;;  %403 = vst.msk [vmem:[#allocation2 + $0x29] sm:$0x1] %vm393_vm4, %v5077_v57 }
  0x19   : > { %s5205_s29 = scalar_lea.vmem %s5896_s0, %s4833_s22  ;;  %404 = vst.msk [vmem:[#allocation2 + $0x39] sm:$0x1] %vm393_vm4, %v5077_v57  ;;  %405 = vst.msk [vmem:[#allocation2 + $0x49] sm:$0x1] %vm393_vm4, %v5077_v57  ;;  %s377_s22 = sand.u32 1, %s5067_s18  }
  0x1a   : > { %v4877_v5 = vld [vmem:[%s5205_s29 + $0x8] sm:$0xff]   ;;  %v4878_v6 = vld [vmem:[%s5205_s29 + $0x10] sm:$0xff]   ;;  %v4880_v7 = vld [vmem:[%s5205_s29 + $0x18] sm:$0xff]   ;;  %406 = vst.msk [vmem:[#allocation2 + $0x59] sm:$0x1] %vm393_vm4, %v5077_v57  ;;  %s378_s30 = scalar_lea.vmem [#allocation6], %s377_s22 }
  0x1b   : > { %4345 = vmatprep.mubr.msk.bf16.mxu0 %vm586_vm1, %v4877_v5  ;;  %v4881_v10 = vld [vmem:[%s5205_s29 + $0x20] sm:$0xff]   ;;  %v4882_v11 = vld [vmem:[%s5205_s29 + $0x28] sm:$0xff]   ;;  %v4883_v12 = vld [vmem:[%s5205_s29 + $0x30] sm:$0xff]   ;;  %407 = vst.msk [vmem:[#allocation2 + $0x69] sm:$0x1] %vm393_vm4, %v5077_v57  ;;  %s3728_s12 = sshll.u32 %s378_s30, 4  ;;  %s5856_s12 = int_to_ptr.vmem [resolvable:$true] %s3728_s12 }
  0x1c   : > { %4346 = vmatmul.mubr.msk.bf16.vlgmr.msra.gmra.mrb[0].mxu0 %vm586_vm1, %v4878_v6  ;;  %v4884_v13 = vld [vmem:[%s5205_s29 + $0x38] sm:$0xff]   ;;  %v4885_v14 = vld [vmem:[%s5205_s29 + $0x40] sm:$0xff]   ;;  %v4887_v15 = vld [vmem:[%s5205_s29 + $0x48] sm:$0xff]   ;;  %408 = vst.msk [vmem:[#allocation2 + $0x79] sm:$0x1] %vm393_vm4, %v5077_v57  ;;  %s5013_s16 = scalar_lea.vmem %s5856_s12, 16  ;;  %p5020_p0 = scmp.lt.s32.totalorder %s5856_s12, %s5018_s25 }
  0x1d   : > { %4378 = vmatpush3.bf16.msra.mxu0 %v4879_v3  ;;  %4349 = vmatprep.mubr.msk.bf16.mxu0 %vm586_vm1, %v4880_v7  ;;  %v4888_v16 = vld [vmem:[%s5205_s29 + $0x50] sm:$0xff]   ;;  %v4889_v17 = vld [vmem:[%s5205_s29 + $0x58] sm:$0xff]   ;;  %v4890_v18 = vld [vmem:[%s5205_s29 + $0x60] sm:$0xff]   ;;  %409 = vst.msk [vmem:[#allocation2 + $0x89] sm:$0x1] %vm393_vm4, %v5077_v57  ;;  %p5014_p11 = scmp.ne.s32.totalorder %s5856_s12, %s5013_s16  ;;  %p5021_p1 = scmp.lt.s32.totalorder %s5019_s13, %s5013_s16 }
  0x1e   : > { %4831 = vmatprep.subr.msk.bf16.mxu0 %vm635_vm0, %v4886_v4  ;;  %v4891_v19 = vld [vmem:[%s5205_s29 + $0x68] sm:$0xff]   ;;  %v4925_v20 = vld [vmem:[%s5205_s29 + $0x78] sm:$0xff]   ;;  %v4892_v21 = vld [vmem:[%s5205_s29 + $0x70] sm:$0xff]   ;;  %416 = vst.msk [vmem:[#allocation3 + $0x8] sm:$0x1] %vm415_vm5, %v5077_v57 }
  0x1f   : > { %4373 = vmatprep.mubr.msk.bf16.mxu1 %vm586_vm1, %v4925_v20  ;;  %v4927_v23 = vld [vmem:[%s5205_s29 + $0x80] sm:$0xff]   ;;  %v4894_v26 = vld [vmem:[%s5205_s29 + $0x8] sm:$0xff]   ;;  %v4896_v27 = vld [vmem:[%s5205_s29 + $0x10] sm:$0xff]   ;;  %417 = vst.msk [vmem:[#allocation3 + $0x10] sm:$0x1] %vm415_vm5, %v5077_v57  ;;  %p5015_p12 = pnand %p5014_p11, %p5178_p5  ;;  %p5022_p2 = por %p5021_p1, %p5020_p0 }
  0x20   : > { %v4893_v24 = vld [vmem:[%s5205_s29] sm:$0xff]   ;;  %4374 = vmatmul.mubr.msk.bf16.vlgmr.msra.gmra.mrb[0].mxu1 %vm586_vm1, %v4927_v23  ;;  %v4897_v28 = vld [vmem:[%s5205_s29 + $0x18] sm:$0xff]   ;;  %v4899_v30 = vld [vmem:[%s5205_s29 + $0x28] sm:$0xff]   ;;  %418 = vst.msk [vmem:[#allocation3 + $0x18] sm:$0x1] %vm415_vm5, %v5077_v57 }
  0x21   : > { %4380 = vmatpush3.bf16.msra.mxu0 %v938_v8  ;;  %v4898_v29 = vld [vmem:[%s5205_s29 + $0x20] sm:$0xff]   ;;  %v4900_v31 = vld [vmem:[%s5205_s29 + $0x30] sm:$0xff]   ;;  %v4901_v32 = vld [vmem:[%s5205_s29 + $0x38] sm:$0xff]   ;;  %4450 = vmatpush3.bf16.msra.mxu1 %v4929_v58  ;;  %419 = vst.msk [vmem:[#allocation3 + $0x20] sm:$0x1] %vm415_vm5, %v5077_v57  ;;  %p5016_p13 = pneg %p5015_p12 }
  0x22   : > { %4413 = vmatprep.subr.bf16.mxu0 %v4895_v9  ;;  %v4902_v33 = vld [vmem:[%s5205_s29 + $0x40] sm:$0xff]   ;;  %v4903_v34 = vld [vmem:[%s5205_s29 + $0x48] sm:$0xff]   ;;  %v4905_v35 = vld [vmem:[%s5205_s29 + $0x50] sm:$0xff]   ;;  %4451 = vmatprep.subr.bf16.mxu1 %v4930_v59  ;;  %420 = vst.msk [vmem:[#allocation3 + $0xd] sm:$0x1] %vm415_vm5, %v5077_v57 }
  0x23   : > { %v4906_v36 = vld [vmem:[%s5205_s29 + $0x58] sm:$0xff]   ;;  %v4907_v37 = vld [vmem:[%s5205_s29 + $0x60] sm:$0xff]   ;;  %v4908_v38 = vld [vmem:[%s5205_s29 + $0x68] sm:$0xff]   ;;  %421 = vst.msk [vmem:[#allocation3 + $0x15] sm:$0x1] %vm415_vm5, %v5077_v57  ;;  %p5023_p3 = pnand %p5022_p2, %p5016_p13 }
  0x24   : > { %4350 = vmatmul.mubr.msk.bf16.gmra.mrb[4].mxu0 %vm586_vm1, %v4881_v10  ;;  %v4909_v39 = vld [vmem:[%s5205_s29 + $0x70] sm:$0xff]   ;;  %v4910_v40 = vld [vmem:[%s5205_s29 + $0x78] sm:$0xff]   ;;  %v4913_v43 = vld [vmem:[%s5205_s29 + $0x20] sm:$0xff]   ;;  %422 = vst.msk [vmem:[#allocation3 + $0x1d] sm:$0x1] %vm415_vm5, %v5077_v57 }
  0x25   : > { %4353 = vmatprep.mubr.msk.bf16.mxu0 %vm586_vm1, %v4882_v11  ;;  %v4911_v41 = vld [vmem:[%s5205_s29 + $0x10] sm:$0xff]   ;;  %v4912_v42 = vld [vmem:[%s5205_s29 + $0x18] sm:$0xff]   ;;  %v4914_v44 = vld [vmem:[%s5205_s29 + $0x28] sm:$0xff]   ;;  %4452 = vmatpush3.bf16.msra.mxu1 %v4930_v59  ;;  %423 = vst.msk [vmem:[#allocation3 + $0x25] sm:$0x1] %vm415_vm5, %v5077_v57 }
  0x26   : > { %v4915_v45 = vld [vmem:[%s5205_s29 + $0x30] sm:$0xff]   ;;  %v4916_v46 = vld [vmem:[%s5205_s29 + $0x38] sm:$0xff]   ;;  %v4917_v47 = vld [vmem:[%s5205_s29 + $0x40] sm:$0xff]   ;;  %4461 = vmatprep.subr.bf16.mxu1 %v5372_v0  ;;  %411 = vst.msk [vmem:[#allocation3] sm:$0x3f] %vm410_vm6, %v5077_v57 }
  0x27   : > { %v4918_v48 = vld [vmem:[%s5205_s29 + $0x48] sm:$0xff]   ;;  %v4919_v49 = vld [vmem:[%s5205_s29 + $0x50] sm:$0xff]   ;;  %v4920_v50 = vld [vmem:[%s5205_s29 + $0x58] sm:$0xff]   ;;  %413 = vst.msk [vmem:[#allocation3 + $0x28] sm:$0x3f] %vm410_vm6, %v5077_v57 }
  0x28   : > { %v4921_v51 = vld [vmem:[%s5205_s29 + $0x60] sm:$0xff]   ;;  %v4922_v52 = vld [vmem:[%s5205_s29 + $0x68] sm:$0xff]   ;;  %v4923_v53 = vld [vmem:[%s5205_s29 + $0x70] sm:$0xff]  }
  0x29   : > { %v4924_v54 = vld [vmem:[%s5205_s29 + $0x78] sm:$0xff]   ;;  %v4926_v55 = vld [vmem:[%s5205_s29 + $0x80] sm:$0xff]   ;;  %v4928_v56 = vld [vmem:[%s5205_s29 + $0x88] sm:$0xff]   ;;  %s4171_s29 = sshll.u32 %s5161_s21, 4  ;;  %s3716_s21 = scalar_lea.sflag [#allocation7], %s377_s22 }
  0x2a   : > { %s5854_s15 = scalar_lea.hbm %s5907_s11, %s4171_s29 }
  0x2c   : > { %4354 = vmatmul.mubr.msk.bf16.gmra.mrb[8].mxu0 %vm586_vm1, %v4883_v12 }
  0x2d   : > { %4357 = vmatprep.mubr.msk.bf16.mxu0 %vm586_vm1, %v4884_v13 }
  0x34   : > { %4358 = vmatmul.mubr.msk.bf16.gmra.mrb[12].mxu0 %vm586_vm1, %v4885_v14 }
  0x35   : > { %4361 = vmatprep.mubr.msk.bf16.mxu0 %vm586_vm1, %v4887_v15 }
  0x3c   : > { %4362 = vmatmul.mubr.msk.bf16.gmra.mrb[16].mxu0 %vm586_vm1, %v4888_v16 }
  0x3d   : > { %4365 = vmatprep.mubr.msk.bf16.mxu0 %vm586_vm1, %v4889_v17 }
  0x44   : > { %4366 = vmatmul.mubr.msk.bf16.gmra.mrb[20].mxu0 %vm586_vm1, %v4890_v18 }
  0x45   : > { %4369 = vmatprep.mubr.msk.bf16.mxu0 %vm586_vm1, %v4891_v19 }
  0x4c   : > { %4370 = vmatmul.mubr.msk.bf16.gmra.mrb[24].mxu0 %vm586_vm1, %v4892_v21 }
  0x4d   : > { %4381 = vmatprep.mubr.msk.bf16.mxu0 %vm586_vm1, %v4893_v24 }
  0x54   : > { %4382 = vmatmul.mubr.msk.bf16.vlgmr.msra.gmra.mrb[0].mxu0 %vm586_vm1, %v4894_v26 }
  0x55   : > { %4414 = vmatpush3.bf16.msra.mxu0 %v4895_v9  ;;  %4385 = vmatprep.mubr.msk.bf16.mxu0 %vm586_vm1, %v4896_v27 }
  0x56   : > { %4832 = vmatprep.subr.msk.bf16.mxu0 %vm635_vm0, %v4904_v22 }
  0x59   : > { %4416 = vmatpush3.bf16.msra.mxu0 %v1276_v25 }
  0x5a   : > { %4593 = vmatprep.subr.bf16.mxu0 %v5077_v57 }
  0x5c   : > { %4386 = vmatmul.mubr.msk.bf16.gmra.mrb[4].mxu0 %vm586_vm1, %v4897_v28 }
  0x5d   : > { %4389 = vmatprep.mubr.msk.bf16.mxu0 %vm586_vm1, %v4898_v29 }
  0x64   : > { %4390 = vmatmul.mubr.msk.bf16.gmra.mrb[8].mxu0 %vm586_vm1, %v4899_v30 }
  0x65   : > { %4393 = vmatprep.mubr.msk.bf16.mxu0 %vm586_vm1, %v4900_v31 }
  0x6c   : > { %4394 = vmatmul.mubr.msk.bf16.gmra.mrb[12].mxu0 %vm586_vm1, %v4901_v32 }
  0x6d   : > { %4397 = vmatprep.mubr.msk.bf16.mxu0 %vm586_vm1, %v4902_v33 }
  0x74   : > { %4398 = vmatmul.mubr.msk.bf16.gmra.mrb[16].mxu0 %vm586_vm1, %v4903_v34 }
  0x75   : > { %4401 = vmatprep.mubr.msk.bf16.mxu0 %vm586_vm1, %v4905_v35 }
  0x7c   : > { %4402 = vmatmul.mubr.msk.bf16.gmra.mrb[20].mxu0 %vm586_vm1, %v4906_v36 }
  0x7d   : > { %4405 = vmatprep.mubr.msk.bf16.mxu0 %vm586_vm1, %v4907_v37 }
  0x84   : > { %4406 = vmatmul.mubr.msk.bf16.gmra.mrb[24].mxu0 %vm586_vm1, %v4908_v38 }
  0x85   : > { %4409 = vmatprep.mubr.msk.bf16.mxu0 %vm586_vm1, %v4909_v39 }
  0x8c   : > { %4410 = vmatmul.mubr.msk.bf16.gmra.mrb[28].mxu0 %vm586_vm1, %v4910_v40 }
  0x8d   : > { %4417 = vmatprep.mubr.msk.bf16.mxu0 %vm586_vm1, %v4911_v41 }
  0x94   : > { %4418 = vmatmul.mubr.msk.bf16.vlgmr.msra.gmra.mrb[0].mxu0 %vm586_vm1, %v4912_v42 }
  0x95   : > { %4421 = vmatprep.mubr.msk.bf16.mxu0 %vm586_vm1, %v4913_v43 }
  0x9c   : > { %4422 = vmatmul.mubr.msk.bf16.gmra.mrb[4].mxu0 %vm586_vm1, %v4914_v44 }
  0x9d   : > { %4425 = vmatprep.mubr.msk.bf16.mxu0 %vm586_vm1, %v4915_v45 }
  0xa4   : > { %4426 = vmatmul.mubr.msk.bf16.gmra.mrb[8].mxu0 %vm586_vm1, %v4916_v46 }
  0xa5   : > { %4429 = vmatprep.mubr.msk.bf16.mxu0 %vm586_vm1, %v4917_v47 }
  0xac   : > { %4430 = vmatmul.mubr.msk.bf16.gmra.mrb[12].mxu0 %vm586_vm1, %v4918_v48 }
  0xad   : > { %4433 = vmatprep.mubr.msk.bf16.mxu0 %vm586_vm1, %v4919_v49 }
  0xb4   : > { %4434 = vmatmul.mubr.msk.bf16.gmra.mrb[16].mxu0 %vm586_vm1, %v4920_v50 }
  0xb5   : > { %4437 = vmatprep.mubr.msk.bf16.mxu0 %vm586_vm1, %v4921_v51 }
  0xbc   : > { %4438 = vmatmul.mubr.msk.bf16.gmra.mrb[20].mxu0 %vm586_vm1, %v4922_v52  ;;  %v1637_v52 = vld [vmem:[#allocation2 + $0x1] sm:$0xff] }
  0xbd   : > { %4441 = vmatprep.mubr.msk.bf16.mxu0 %vm586_vm1, %v4923_v53 }
  0xc4   : > { %4442 = vmatmul.mubr.msk.bf16.gmra.mrb[24].mxu0 %vm586_vm1, %v4924_v54 }
  0xc5   : > { %4445 = vmatprep.mubr.msk.bf16.mxu0 %vm586_vm1, %v4926_v55 }
  0xcc   : > { %4446 = vmatmul.mubr.msk.bf16.gmra.mrb[28].mxu0 %vm586_vm1, %v4928_v56 }
  0xcd   : > { %4601 = vmatprep.mubr.msk.bf16.mxu0 %vm5078_vm7, %v5077_v57 }
  0xf3   : > { %v5361_v60 = vpop.f32.mrb[0].mxu1 }
  0xf4   : > { %v5363_v61 = vpop.f32.mrb[1].mxu1 }
  0xf5   : > { %v5365_v62 = vpop.f32.mrb[2].mxu1 }
  0xf6   : > { %v5367_v63 = vpop.f32.mrb[3].mxu1 }
 0x167   : > { %v4419_v2 = vpop.f32.mrb[0].mxu0 }
 0x168   : > { %v1479_v3 = vadd.f32 %v4419_v2, %v5378_v1  ;;  %v1312_v4 = vpop.f32.mrb[1].mxu0 }
 0x169   : > { %v1477_v5 = vadd.f32 %v5378_v1, %v1312_v4  ;;  %v4420_v6 = vpop.f32.mrb[2].mxu0 }
 0x16a   : > { %v1511_v7 = vmax.f32 %v1479_v3, 0.0  ;;  %v1480_v8 = vadd.f32 %v4420_v6, %v5378_v1  ;;  %v1315_v9 = vpop.f32.mrb[3].mxu0 }
 0x16b   : > { %v1509_v10 = vmax.f32 %v1477_v5, 0.0  ;;  %v1478_v11 = vadd.f32 %v5378_v1, %v1315_v9 }
 0x16c   : > { %v1512_v12 = vmax.f32 %v1480_v8, 0.0 }
 0x16d   : > { %v1541_v13 = vmax.f32 %v1509_v10, %v1511_v7  ;;  %v1510_v14 = vmax.f32 %v1478_v11, 0.0 }
 0x16f   : > { %1557 = vst.msk [vmem:[#allocation4] sm:$0xff] %vm385_vm2, %v1541_v13  ;;  %v1542_v15 = vmax.f32 %v1510_v14, %v1512_v12  ;;  %v4423_v16 = vpop.f32.mrb[4].mxu0 }
 0x170   : > { %v1483_v17 = vadd.f32 %v4423_v16, %v5378_v1  ;;  %v1328_v18 = vpop.f32.mrb[5].mxu0 }
 0x171   : > { %1558 = vst.msk [vmem:[#allocation4 + $0x8] sm:$0xff] %vm385_vm2, %v1542_v15  ;;  %v1481_v19 = vadd.f32 %v5378_v1, %v1328_v18  ;;  %v4424_v20 = vpop.f32.mrb[6].mxu0 }
 0x172   : > { %v1515_v21 = vmax.f32 %v1483_v17, 0.0  ;;  %v1484_v22 = vadd.f32 %v4424_v20, %v5378_v1  ;;  %v1331_v23 = vpop.f32.mrb[7].mxu0 }
 0x173   : > { %v1513_v24 = vmax.f32 %v1481_v19, 0.0  ;;  %v1482_v25 = vadd.f32 %v5378_v1, %v1331_v23 }
 0x174   : > { %v1516_v26 = vmax.f32 %v1484_v22, 0.0 }
 0x175   : > { %v1543_v27 = vmax.f32 %v1513_v24, %v1515_v21  ;;  %v1514_v28 = vmax.f32 %v1482_v25, 0.0 }
 0x177   : > { %1559 = vst.msk [vmem:[#allocation4 + $0x10] sm:$0xff] %vm385_vm2, %v1543_v27  ;;  %v1544_v29 = vmax.f32 %v1514_v28, %v1516_v26  ;;  %v4427_v30 = vpop.f32.mrb[8].mxu0 }
 0x178   : > { %v1573_v31 = vld [vmem:[#allocation4] ss:$2 sm:$0xff]  ;;  %v1589_v32 = vld [vmem:[#allocation4 + $0x1] ss:$2 sm:$0xff]  ;;  %v1487_v33 = vadd.f32 %v4427_v30, %v5378_v1  ;;  %v1344_v34 = vpop.f32.mrb[9].mxu0 }
 0x179   : > { %v1604_v35 = vmax.f32 %v1573_v31, %v1589_v32  ;;  %1560 = vst.msk [vmem:[#allocation4 + $0x18] sm:$0xff] %vm385_vm2, %v1544_v29  ;;  %v1485_v36 = vadd.f32 %v5378_v1, %v1344_v34  ;;  %v4428_v37 = vpop.f32.mrb[10].mxu0 }
 0x17a   : > { %v1519_v38 = vmax.f32 %v1487_v33, 0.0  ;;  %v1488_v39 = vadd.f32 %v4428_v37, %v5378_v1  ;;  %v1347_v40 = vpop.f32.mrb[11].mxu0 }
 0x17b   : > { %1612 = vst.msk [vmem:[#allocation2 + $0x11] sm:$0xff] %vm385_vm2, %v1604_v35  ;;  %v1517_v41 = vmax.f32 %v1485_v36, 0.0  ;;  %v1486_v42 = vadd.f32 %v5378_v1, %v1347_v40 }
 0x17c   : > { %v1520_v43 = vmax.f32 %v1488_v39, 0.0 }
 0x17d   : > { %v1545_v44 = vmax.f32 %v1517_v41, %v1519_v38  ;;  %v1518_v45 = vmax.f32 %v1486_v42, 0.0 }
 0x17f   : > { %1561 = vst.msk [vmem:[#allocation4 + $0x20] sm:$0xff] %vm385_vm2, %v1545_v44  ;;  %v1546_v46 = vmax.f32 %v1518_v45, %v1520_v43  ;;  %v4431_v47 = vpop.f32.mrb[12].mxu0  ;;  %v4932_v44 = vld [vmem:[%s5899_s3 + $0x8] sm:$0xff]  }
 0x180   : > { %v1575_v48 = vld [vmem:[#allocation4 + $0x10] ss:$2 sm:$0xff]  ;;  %v1591_v49 = vld [vmem:[#allocation4 + $0x11] ss:$2 sm:$0xff]  ;;  %v1491_v50 = vadd.f32 %v4431_v47, %v5378_v1  ;;  %v1360_v51 = vpop.f32.mrb[13].mxu0 }
 0x181   : > { %v1605_v53 = vmax.f32 %v1575_v48, %v1591_v49  ;;  %1562 = vst.msk [vmem:[#allocation4 + $0x28] sm:$0xff] %vm385_vm2, %v1546_v46  ;;  %v1489_v54 = vadd.f32 %v5378_v1, %v1360_v51  ;;  %v4432_v55 = vpop.f32.mrb[14].mxu0 }
 0x182   : > { %v1523_v56 = vmax.f32 %v1491_v50, 0.0  ;;  %v1492_v58 = vadd.f32 %v4432_v55, %v5378_v1  ;;  %v1363_v59 = vpop.f32.mrb[15].mxu0  ;;  %v5402_v2 = vld [vmem:[#allocation2 + $0x11] sm:$0xff]  ;;  %v5442_v50 = vld [vmem:[%s5899_s3 + $0x20] sm:$0xff]  }
 0x183   : > { %1613 = vst.msk [vmem:[#allocation2 + $0x21] sm:$0xff] %vm385_vm2, %v1605_v53  ;;  %v1521_v3 = vmax.f32 %v1489_v54, 0.0  ;;  %v1490_v4 = vadd.f32 %v5378_v1, %v1363_v59  ;;  %v1645_v5 = vpack.c.bf16 %v5402_v2, %v1637_v52 }
 0x184   : > { %v1524_v6 = vmax.f32 %v1492_v58, 0.0 }
 0x185   : > { %v1547_v7 = vmax.f32 %v1521_v3, %v1523_v56  ;;  %v1522_v8 = vmax.f32 %v1490_v4, 0.0  ;;  %4453 = vmatprep.mubr.msk.bf16.mxu1 %vm385_vm2, %v1645_v5 }
 0x187   : > { %1563 = vst.msk [vmem:[#allocation4 + $0x30] sm:$0xff] %vm385_vm2, %v1547_v7  ;;  %v1548_v9 = vmax.f32 %v1522_v8, %v1524_v6  ;;  %v4435_v10 = vpop.f32.mrb[16].mxu0 }
 0x188   : > { %v1577_v11 = vld [vmem:[#allocation4 + $0x20] ss:$2 sm:$0xff]  ;;  %v1593_v12 = vld [vmem:[#allocation4 + $0x21] ss:$2 sm:$0xff]  ;;  %v1495_v13 = vadd.f32 %v4435_v10, %v5378_v1  ;;  %v1376_v14 = vpop.f32.mrb[17].mxu0 }
 0x189   : > { %v1606_v15 = vmax.f32 %v1577_v11, %v1593_v12  ;;  %1564 = vst.msk [vmem:[#allocation4 + $0x38] sm:$0xff] %vm385_vm2, %v1548_v9  ;;  %v1493_v16 = vadd.f32 %v5378_v1, %v1376_v14  ;;  %v4436_v17 = vpop.f32.mrb[18].mxu0 }
 0x18a   : > { %v1527_v18 = vmax.f32 %v1495_v13, 0.0  ;;  %v1496_v19 = vadd.f32 %v4436_v17, %v5378_v1  ;;  %v1379_v20 = vpop.f32.mrb[19].mxu0  ;;  %v5413_v21 = vld [vmem:[#allocation2 + $0x21] sm:$0xff] }
 0x18b   : > { %1614 = vst.msk [vmem:[#allocation2 + $0x31] sm:$0xff] %vm385_vm2, %v1606_v15  ;;  %v1525_v22 = vmax.f32 %v1493_v16, 0.0  ;;  %v1494_v23 = vadd.f32 %v5378_v1, %v1379_v20  ;;  %v2068_v24 = vpack.c.bf16 %v5413_v21, %v5402_v2  ;;  %v4941_v2 = vld [vmem:[%s5899_s3 + $0x60] sm:$0xff]  }
 0x18c   : > { %v1528_v25 = vmax.f32 %v1496_v19, 0.0 }
 0x18d   : > { %v1549_v26 = vmax.f32 %v1525_v22, %v1527_v18  ;;  %v1526_v27 = vmax.f32 %v1494_v23, 0.0 }
 0x18f   : > { %1565 = vst.msk [vmem:[#allocation4 + $0x40] sm:$0xff] %vm385_vm2, %v1549_v26  ;;  %v1550_v28 = vmax.f32 %v1526_v27, %v1528_v25  ;;  %v4439_v29 = vpop.f32.mrb[20].mxu0 }
 0x190   : > { %v1579_v30 = vld [vmem:[#allocation4 + $0x30] ss:$2 sm:$0xff]  ;;  %v1595_v31 = vld [vmem:[#allocation4 + $0x31] ss:$2 sm:$0xff]  ;;  %v1499_v32 = vadd.f32 %v4439_v29, %v5378_v1  ;;  %v1392_v33 = vpop.f32.mrb[21].mxu0 }
 0x191   : > { %v1607_v34 = vmax.f32 %v1579_v30, %v1595_v31  ;;  %1566 = vst.msk [vmem:[#allocation4 + $0x48] sm:$0xff] %vm385_vm2, %v1550_v28  ;;  %v1497_v35 = vadd.f32 %v5378_v1, %v1392_v33  ;;  %v4440_v36 = vpop.f32.mrb[22].mxu0 }
 0x192   : > { %v1531_v37 = vmax.f32 %v1499_v32, 0.0  ;;  %v1500_v38 = vadd.f32 %v4440_v36, %v5378_v1  ;;  %v1395_v39 = vpop.f32.mrb[23].mxu0  ;;  %v5424_v40 = vld [vmem:[#allocation2 + $0x31] sm:$0xff] }
 0x193   : > { %1615 = vst.msk [vmem:[#allocation2 + $0x41] sm:$0xff] %vm385_vm2, %v1607_v34  ;;  %v1529_v41 = vmax.f32 %v1497_v35, 0.0  ;;  %v1498_v42 = vadd.f32 %v5378_v1, %v1395_v39  ;;  %v5430_v43 = vpack.c.bf16 %v5424_v40, %v5413_v21 }
 0x194   : > { %v1532_v45 = vmax.f32 %v1500_v38, 0.0 }
 0x195   : > { %v1551_v46 = vmax.f32 %v1529_v41, %v1531_v37  ;;  %v1530_v47 = vmax.f32 %v1498_v42, 0.0  ;;  %4454 = vmatmul.mubr.msk.bf16.vlgmr.msra.gmra.mrb[4].mxu1 %vm385_vm2, %v5430_v43  ;;  %v1621_v37 = vld [vmem:[#allocation2] sm:$0xff] }
 0x196   : > { %4462 = vmatpush3.bf16.msra.mxu1 %v5372_v0 }
 0x197   : > { %1567 = vst.msk [vmem:[#allocation4 + $0x50] sm:$0xff] %vm385_vm2, %v1551_v46  ;;  %v1552_v48 = vmax.f32 %v1530_v47, %v1532_v45  ;;  %v4443_v49 = vpop.f32.mrb[24].mxu0  ;;  %4463 = vmatprep.subr.bf16.mxu1 %v4932_v44  ;;  %v1624_v46 = vld [vmem:[#allocation2 + $0x30] sm:$0xff] }
 0x198   : > { %v1581_v51 = vld [vmem:[#allocation4 + $0x40] ss:$2 sm:$0xff]  ;;  %v1597_v52 = vld [vmem:[#allocation4 + $0x41] ss:$2 sm:$0xff]  ;;  %v1503_v53 = vadd.f32 %v4443_v49, %v5378_v1  ;;  %v1408_v54 = vpop.f32.mrb[25].mxu0 }
 0x199   : > { %v1608_v55 = vmax.f32 %v1581_v51, %v1597_v52  ;;  %1568 = vst.msk [vmem:[#allocation4 + $0x58] sm:$0xff] %vm385_vm2, %v1552_v48  ;;  %v1501_v0 = vadd.f32 %v5378_v1, %v1408_v54  ;;  %v4444_v56 = vpop.f32.mrb[26].mxu0  ;;  %v1623_v48 = vld [vmem:[#allocation2 + $0x20] sm:$0xff]  ;;  %v4934_v52 = vld [vmem:[%s5899_s3 + $0x28] sm:$0xff]   ;;  %v4935_v54 = vld [vmem:[%s5899_s3 + $0x30] sm:$0xff]  }
 0x19a   : > { %v1535_v58 = vmax.f32 %v1503_v53, 0.0  ;;  %v1504_v59 = vadd.f32 %v4444_v56, %v5378_v1  ;;  %v1411_v3 = vpop.f32.mrb[27].mxu0  ;;  %v5448_v4 = vld [vmem:[#allocation2 + $0x41] sm:$0xff]  ;;  %4464 = vmatpush3.bf16.msra.mxu1 %v4932_v44  ;;  %v5489_v49 = vpack.c.bf16 %v1624_v46, %v1623_v48  ;;  %v1833_v56 = vld [vmem:[#allocation2 + $0x12] sm:$0xff] }
 0x19b   : > { %1616 = vst.msk [vmem:[#allocation2 + $0x51] sm:$0xff] %vm385_vm2, %v1608_v55  ;;  %v1533_v5 = vmax.f32 %v1501_v0, 0.0  ;;  %v1502_v6 = vadd.f32 %v5378_v1, %v1411_v3  ;;  %4473 = vmatprep.subr.bf16.mxu1 %v5442_v50  ;;  %v2069_v7 = vpack.c.bf16 %v5448_v4, %v5424_v40  ;;  %v1625_v51 = vld [vmem:[#allocation2 + $0x40] sm:$0xff] }
 0x19c   : > { %v1536_v8 = vmax.f32 %v1504_v59, 0.0  ;;  %v1832_v0 = vld [vmem:[#allocation2 + $0x2] sm:$0xff] }
 0x19d   : > { %v1553_v9 = vmax.f32 %v1533_v5, %v1535_v58  ;;  %v1534_v10 = vmax.f32 %v1502_v6, 0.0  ;;  %v1840_v3 = vpack.c.bf16 %v1833_v56, %v1832_v0  ;;  %v1834_v6 = vld [vmem:[#allocation2 + $0x22] sm:$0xff] }
 0x19f   : > { %1569 = vst.msk [vmem:[#allocation4 + $0x60] sm:$0xff] %vm385_vm2, %v1553_v9  ;;  %v1554_v11 = vmax.f32 %v1534_v10, %v1536_v8  ;;  %v4447_v12 = vpop.f32.mrb[28].mxu0  ;;  %v1836_v9 = vld [vmem:[#allocation2 + $0x42] sm:$0xff]  ;;  %v4936_v10 = vld [vmem:[%s5899_s3 + $0x38] sm:$0xff]  }
 0x1a0   : > { %v1583_v13 = vld [vmem:[#allocation4 + $0x50] ss:$2 sm:$0xff]  ;;  %v1599_v14 = vld [vmem:[#allocation4 + $0x51] ss:$2 sm:$0xff]  ;;  %v4701_v15 = vadd.f32 %v4447_v12, %v5361_v60  ;;  %v1424_v16 = vpop.f32.mrb[29].mxu0 }
 0x1a1   : > { %v1609_v17 = vmax.f32 %v1583_v13, %v1599_v14  ;;  %1570 = vst.msk [vmem:[#allocation4 + $0x68] sm:$0xff] %vm385_vm2, %v1554_v11  ;;  %v4702_v18 = vadd.f32 %v1424_v16, %v5363_v61  ;;  %v4448_v19 = vpop.f32.mrb[30].mxu0  ;;  %v4937_v12 = vld [vmem:[%s5899_s3 + $0x40] sm:$0xff]  }
 0x1a2   : > { %v1507_v20 = vadd.f32 %v4701_v15, %v5378_v1  ;;  %v4703_v22 = vadd.f32 %v4448_v19, %v5365_v62  ;;  %v1427_v23 = vpop.f32.mrb[31].mxu0  ;;  %v5461_v25 = vld [vmem:[#allocation2 + $0x51] sm:$0xff] }
 0x1a3   : > { %1617 = vst.msk [vmem:[#allocation2 + $0x61] sm:$0xff] %vm385_vm2, %v1609_v17  ;;  %v1505_v26 = vadd.f32 %v4702_v18, %v5378_v1  ;;  %v4704_v60 = vadd.f32 %v1427_v23, %v5367_v63  ;;  %v5468_v27 = vpack.c.bf16 %v5461_v25, %v5448_v4  ;;  %v1626_v47 = vld [vmem:[#allocation2 + $0x50] sm:$0xff]  ;;  %v1955_v17 = vpack.c.bf16 %v1625_v51, %v1624_v46  ;;  %v4938_v18 = vld [vmem:[%s5899_s3 + $0x48] sm:$0xff]  }
 0x1a4   : > { %v1539_v28 = vmax.f32 %v1507_v20, 0.0  ;;  %v1508_v61 = vadd.f32 %v4703_v22, %v5378_v1  ;;  %v5494_v53 = vpack.c.bf16 %v1626_v47, %v1625_v51  ;;  %v1837_v5 = vld [vmem:[#allocation2 + $0x52] sm:$0xff]  ;;  %v4942_v4 = vld [vmem:[%s5899_s3 + $0x68] sm:$0xff]  }
 0x1a5   : > { %v1537_v29 = vmax.f32 %v1505_v26, 0.0  ;;  %v1506_v30 = vadd.f32 %v4704_v60, %v5378_v1  ;;  %4457 = vmatprep.mubr.msk.bf16.mxu1 %vm385_vm2, %v5468_v27  ;;  %v1622_v1 = vld [vmem:[#allocation2 + $0x10] sm:$0xff]  ;;  %v5514_v11 = vpack.c.bf16 %v1837_v5, %v1836_v9  ;;  %v4940_v26 = vld [vmem:[%s5899_s3 + $0x58] sm:$0xff]  }
 0x1a6   : > { %v1540_v62 = vmax.f32 %v1508_v61, 0.0  ;;  %v1629_v45 = vpack.c.bf16 %v1622_v1, %v1621_v37  ;;  %v1954_v16 = vpack.c.bf16 %v1623_v48, %v1622_v1  ;;  %v4939_v20 = vld [vmem:[%s5899_s3 + $0x50] sm:$0xff]   ;;  %v4949_v37 = vld [vmem:[%s5901_s5 + $0x28] sm:$0xff]  }
 0x1a7   : > { %v1555_v31 = vmax.f32 %v1537_v29, %v1539_v28  ;;  %v1538_v32 = vmax.f32 %v1506_v30, 0.0  ;;  %v2182_v28 = vpack.c.bf16 %v1834_v6, %v1833_v56  ;;  %v4944_v30 = vld [vmem:[%s5899_s3 + $0x78] sm:$0xff]   ;;  %v4950_v1 = vld [vmem:[%s5901_s5 + $0x68] sm:$0xff]  }
 0x1a8   : > { %v1585_v33 = vld [vmem:[#allocation4 + $0x60] ss:$2 sm:$0xff]  ;;  %v1601_v34 = vld [vmem:[#allocation4 + $0x61] ss:$2 sm:$0xff] }
 0x1a9   : > { %v1610_v35 = vmax.f32 %v1585_v33, %v1601_v34  ;;  %1571 = vst.msk [vmem:[#allocation4 + $0x70] sm:$0xff] %vm385_vm2, %v1555_v31  ;;  %v1556_v63 = vmax.f32 %v1538_v32, %v1540_v62  ;;  %v4945_v62 = vld [vmem:[%s5899_s3 + $0x80] sm:$0xff]   ;;  %v2296_v31 = vld [vmem:[#allocation2 + $0x90] sm:$0xff]  ;;  %v4946_v33 = vld [vmem:[%s5899_s3 + $0x88] sm:$0xff]  }
 0x1aa   : > { %v5477_v36 = vld [vmem:[#allocation2 + $0x61] sm:$0xff]  ;;  %v2410_v34 = vld [vmem:[#allocation2 + $0x91] sm:$0xff] }
 0x1ab   : > { %1618 = vst.msk [vmem:[#allocation2 + $0x71] sm:$0xff] %vm385_vm2, %v1610_v35  ;;  %1572 = vst.msk [vmem:[#allocation4 + $0x78] sm:$0xff] %vm385_vm2, %v1556_v63  ;;  %v1627_v58 = vld [vmem:[#allocation2 + $0x60] sm:$0xff]  ;;  %v2070_v60 = vpack.c.bf16 %v5477_v36, %v5461_v25  ;;  %v4943_v25 = vld [vmem:[%s5899_s3 + $0x70] sm:$0xff]  }
 0x1ac   : > { %v1838_v14 = vld [vmem:[#allocation2 + $0x62] sm:$0xff]  ;;  %v1956_v19 = vpack.c.bf16 %v1627_v58, %v1626_v47 }
 0x1ad   : > { %v4947_v63 = vld [vmem:[%s5901_s5 + $0x60] sm:$0xff]  }
 0x1ae   : > { %4594 = vmatpush3.bf16.msra.mxu0 %v4947_v63 }
 0x1af   : > { %4595 = vmatprep.subr.bf16.mxu0 %v5077_v57 }
 0x1b2   : > { %v1587_v38 = vld [vmem:[#allocation4 + $0x70] ss:$2 sm:$0xff]  ;;  %v1603_v39 = vld [vmem:[#allocation4 + $0x71] ss:$2 sm:$0xff]  ;;  %v5479_v41 = vld [vmem:[#allocation2 + $0x71] sm:$0xff]  ;;  %4596 = vmatpush3.bf16.msra.mxu0 %v4950_v1 }
 0x1b3   : > { %v1611_v42 = vmax.f32 %v1587_v38, %v1603_v39  ;;  %v5483_v44 = vpack.c.bf16 %v5479_v41, %v5477_v36  ;;  %v1628_v55 = vld [vmem:[#allocation2 + $0x70] sm:$0xff]  ;;  %v4948_v36 = vld [vmem:[%s5901_s5 + $0x20] sm:$0xff]   ;;  %4597 = vmatprep.subr.bf16.mxu0 %v5077_v57 }
 0x1b4   : > { %v5504_v59 = vpack.c.bf16 %v1628_v55, %v1627_v58  ;;  %v1839_v13 = vld [vmem:[#allocation2 + $0x72] sm:$0xff] }
 0x1b5   : > { %1619 = vst.msk [vmem:[#allocation2 + $0x81] sm:$0xff] %vm385_vm2, %v1611_v42  ;;  %4458 = vmatmul.mubr.msk.bf16.gmra.mrb[8].mxu1 %vm385_vm2, %v5483_v44  ;;  %v5523_v15 = vpack.c.bf16 %v1839_v13, %v1838_v14  ;;  %v4951_v38 = vld [vmem:[%s5901_s5 + $0x30] sm:$0xff]   ;;  %v4954_v42 = vld [vmem:[%s5901_s5 + $0x78] sm:$0xff]  }
 0x1b6   : > { %4465 = vmatprep.mubr.msk.bf16.mxu1 %vm385_vm2, %v1629_v45  ;;  %v4952_v39 = vld [vmem:[%s5901_s5 + $0x70] sm:$0xff]  }
 0x1b7   : > { %4598 = vmatpush3.bf16.msra.mxu0 %v4952_v39 }
 0x1b8   : > { %4599 = vmatprep.subr.bf16.mxu0 %v5077_v57 }
 0x1bb   : > { %4600 = vmatpush3.bf16.msra.mxu0 %v4954_v42 }
 0x1bc   : > { %v1953_v22 = vld [vmem:[#allocation2 + $0x80] sm:$0xff]  ;;  %4617 = vmatprep.subr.bf16.mxu0 %v5077_v57 }
 0x1bd   : > { %4466 = vmatmul.mubr.msk.bf16.vlgmr.msra.gmra.mrb[4].mxu1 %vm385_vm2, %v5489_v49  ;;  %v1957_v23 = vpack.c.bf16 %v1953_v22, %v1628_v55  ;;  %v2067_v21 = vld [vmem:[#allocation2 + $0x81] sm:$0xff]  ;;  %v2300_v32 = vpack.c.bf16 %v2296_v31, %v1953_v22 }
 0x1be   : > { %4469 = vmatprep.mubr.msk.bf16.mxu1 %vm385_vm2, %v5494_v53  ;;  %4474 = vmatpush3.bf16.msra.mxu1 %v5442_v50  ;;  %v1835_v50 = vld [vmem:[#allocation2 + $0x32] sm:$0xff]  ;;  %v2181_v61 = vld [vmem:[#allocation2 + $0x82] sm:$0xff]  ;;  %v2414_v35 = vpack.c.bf16 %v2410_v34, %v2067_v21 }
 0x1bf   : > { %4475 = vmatprep.subr.bf16.mxu1 %v4934_v52  ;;  %v5509_v8 = vpack.c.bf16 %v1835_v50, %v1834_v6  ;;  %v2183_v40 = vpack.c.bf16 %v1836_v9, %v1835_v50  ;;  %v2185_v29 = vpack.c.bf16 %v2181_v61, %v1839_v13  ;;  %v4963_v34 = vld [vmem:[%s5901_s5 + $0x10] sm:$0xff]  }
 0x1c2   : > { %4476 = vmatpush3.bf16.msra.mxu1 %v4934_v52 }
 0x1c3   : > { %4485 = vmatprep.subr.bf16.mxu1 %v4935_v54 }
 0x1c5   : > { %4470 = vmatmul.mubr.msk.bf16.gmra.mrb[8].mxu1 %vm385_vm2, %v5504_v59 }
 0x1c6   : > { %4477 = vmatprep.mubr.msk.bf16.mxu1 %vm385_vm2, %v1840_v3 }
 0x1cd   : > { %4478 = vmatmul.mubr.msk.bf16.vlgmr.msra.gmra.mrb[4].mxu1 %vm385_vm2, %v5509_v8 }
 0x1ce   : > { %4481 = vmatprep.mubr.msk.bf16.mxu1 %vm385_vm2, %v5514_v11  ;;  %4486 = vmatpush3.bf16.msra.mxu1 %v4935_v54 }
 0x1cf   : > { %4487 = vmatprep.subr.bf16.mxu1 %v4936_v10 }
 0x1d2   : > { %4488 = vmatpush3.bf16.msra.mxu1 %v4936_v10 }
 0x1d3   : > { %4497 = vmatprep.subr.bf16.mxu1 %v4937_v12 }
 0x1d5   : > { %4482 = vmatmul.mubr.msk.bf16.gmra.mrb[8].mxu1 %vm385_vm2, %v5523_v15 }
 0x1d6   : > { %4489 = vmatprep.mubr.msk.bf16.mxu1 %vm385_vm2, %v1954_v16 }
 0x1dd   : > { %4490 = vmatmul.mubr.msk.bf16.vlgmr.msra.gmra.mrb[4].mxu1 %vm385_vm2, %v1955_v17 }
 0x1de   : > { %4493 = vmatprep.mubr.msk.bf16.mxu1 %vm385_vm2, %v1956_v19  ;;  %4498 = vmatpush3.bf16.msra.mxu1 %v4937_v12 }
 0x1df   : > { %4499 = vmatprep.subr.bf16.mxu1 %v4938_v18 }
 0x1e2   : > { %4500 = vmatpush3.bf16.msra.mxu1 %v4938_v18 }
 0x1e3   : > { %4509 = vmatprep.subr.bf16.mxu1 %v4939_v20 }
 0x1e5   : > { %4494 = vmatmul.mubr.msk.bf16.gmra.mrb[8].mxu1 %vm385_vm2, %v1957_v23 }
 0x1e6   : > { %4501 = vmatprep.mubr.msk.bf16.mxu1 %vm385_vm2, %v2068_v24  ;;  %v2071_v24 = vpack.c.bf16 %v2067_v21, %v5479_v41  ;;  %v4953_v41 = vld [vmem:[%s5901_s5 + $0x38] sm:$0xff]  }
 0x1ed   : > { %4502 = vmatmul.mubr.msk.bf16.vlgmr.msra.gmra.mrb[4].mxu1 %vm385_vm2, %v2069_v7  ;;  %v2184_v7 = vpack.c.bf16 %v1838_v14, %v1837_v5 }
 0x1ee   : > { %4505 = vmatprep.mubr.msk.bf16.mxu1 %vm385_vm2, %v2070_v60  ;;  %4510 = vmatpush3.bf16.msra.mxu1 %v4939_v20 }
 0x1ef   : > { %4511 = vmatprep.subr.bf16.mxu1 %v4940_v26 }
 0x1f2   : > { %4512 = vmatpush3.bf16.msra.mxu1 %v4940_v26 }
 0x1f3   : > { %4521 = vmatprep.subr.bf16.mxu1 %v4941_v2 }
 0x1f5   : > { %4506 = vmatmul.mubr.msk.bf16.gmra.mrb[8].mxu1 %vm385_vm2, %v2071_v24 }
 0x1f6   : > { %4513 = vmatprep.mubr.msk.bf16.mxu1 %vm385_vm2, %v2182_v28 }
 0x1fd   : > { %4514 = vmatmul.mubr.msk.bf16.vlgmr.msra.gmra.mrb[4].mxu1 %vm385_vm2, %v2183_v40 }
 0x1fe   : > { %4517 = vmatprep.mubr.msk.bf16.mxu1 %vm385_vm2, %v2184_v7  ;;  %4522 = vmatpush3.bf16.msra.mxu1 %v4941_v2  ;;  %v4957_v7 = vld [vmem:[%s5901_s5] sm:$0xff]  }
 0x1ff   : > { %4523 = vmatprep.subr.bf16.mxu1 %v4942_v4 }
 0x202   : > { %4524 = vmatpush3.bf16.msra.mxu1 %v4942_v4 }
 0x203   : > { %4533 = vmatprep.subr.bf16.mxu1 %v4943_v25 }
 0x205   : > { %4518 = vmatmul.mubr.msk.bf16.gmra.mrb[8].mxu1 %vm385_vm2, %v2185_v29 }
 0x206   : > { %4525 = vmatprep.mubr.msk.bf16.mxu1 %vm385_vm2, %v5489_v49 }
 0x20d   : > { %4526 = vmatmul.mubr.msk.bf16.vlgmr.msra.gmra.mrb[4].mxu1 %vm385_vm2, %v5494_v53 }
 0x20e   : > { %4529 = vmatprep.mubr.msk.bf16.mxu1 %vm385_vm2, %v5504_v59  ;;  %4534 = vmatpush3.bf16.msra.mxu1 %v4943_v25 }
 0x20f   : > { %4535 = vmatprep.subr.bf16.mxu1 %v4944_v30 }
 0x212   : > { %4536 = vmatpush3.bf16.msra.mxu1 %v4944_v30 }
 0x213   : > { %4545 = vmatprep.subr.bf16.mxu1 %v4945_v62 }
 0x215   : > { %4530 = vmatmul.mubr.msk.bf16.gmra.mrb[8].mxu1 %vm385_vm2, %v2300_v32  ;;  %v4961_v32 = vld [vmem:[%s5901_s5 + $0x8] sm:$0xff]  }
 0x216   : > { %4537 = vmatprep.mubr.msk.bf16.mxu1 %vm385_vm2, %v5430_v43  ;;  %v2524_v43 = vld [vmem:[#allocation2 + $0x92] sm:$0xff] }
 0x21d   : > { %4538 = vmatmul.mubr.msk.bf16.vlgmr.msra.gmra.mrb[4].mxu1 %vm385_vm2, %v5468_v27  ;;  %v2528_v27 = vpack.c.bf16 %v2524_v43, %v2181_v61  ;;  %v4965_v43 = vld [vmem:[%s5901_s5 + $0x18] sm:$0xff]  }
 0x21e   : > { %4541 = vmatprep.mubr.msk.bf16.mxu1 %vm385_vm2, %v5483_v44  ;;  %4546 = vmatpush3.bf16.msra.mxu1 %v4945_v62  ;;  %v4047_v44 = vld [vmem:[%s5900_s4] ss:$0 sm:$0xff] }
 0x21f   : > { %4547 = vmatprep.subr.bf16.mxu1 %v4946_v33  ;;  %v4960_v62 = vld [vmem:[%s5901_s5 + $0xa0] sm:$0xff]  }
 0x222   : > { %4548 = vmatpush3.bf16.msra.mxu1 %v4946_v33  ;;  %v4962_v33 = vld [vmem:[%s5901_s5 + $0xa8] sm:$0xff]  }
 0x223   : > { %4557 = vmatprep.subr.bf16.mxu1 %v5077_v57 }
 0x225   : > { %4542 = vmatmul.mubr.msk.bf16.gmra.mrb[8].mxu1 %vm385_vm2, %v2414_v35  ;;  %v4964_v35 = vld [vmem:[%s5901_s5 + $0xb0] sm:$0xff]  }
 0x226   : > { %4549 = vmatprep.mubr.msk.bf16.mxu1 %vm385_vm2, %v5509_v8 }
 0x22d   : > { %4550 = vmatmul.mubr.msk.bf16.vlgmr.msra.gmra.mrb[4].mxu1 %vm385_vm2, %v5514_v11 }
 0x22e   : > { %4553 = vmatprep.mubr.msk.bf16.mxu1 %vm385_vm2, %v5523_v15  ;;  %4558 = vmatpush3.bf16.msra.mxu1 %v4948_v36 }
 0x22f   : > { %4559 = vmatprep.subr.bf16.mxu1 %v5077_v57 }
 0x232   : > { %4560 = vmatpush3.bf16.msra.mxu1 %v4949_v37 }
 0x233   : > { %4561 = vmatprep.subr.bf16.mxu1 %v5077_v57 }
 0x235   : > { %4554 = vmatmul.mubr.msk.bf16.gmra.mrb[8].mxu1 %vm385_vm2, %v2528_v27  ;;  %v4966_v27 = vld [vmem:[%s5901_s5 + $0xb8] sm:$0xff]  }
 0x236   : > { %4565 = vmatprep.mubr.msk.bf16.mxu1 %vm5078_vm7, %v5077_v57  ;;  %4562 = vmatpush3.bf16.msra.mxu1 %v4951_v38  ;;  %v4971_v38 = vld [vmem:[%s5901_s5 + $0x40] sm:$0xff]  }
 0x237   : > { %4563 = vmatprep.subr.bf16.mxu1 %v5077_v57 }
 0x23a   : > { %4564 = vmatpush3.bf16.msra.mxu1 %v4953_v41  ;;  %v4972_v41 = vld [vmem:[%s5901_s5 + $0xe0] sm:$0xff]  }
 0x23b   : > { %4569 = vmatprep.subr.bf16.mxu1 %v5077_v57 }
 0x300   : > { %v4551_v45 = vpop.f32.mrb[4].mxu1 }
 0x301   : > { %v2639_v46 = vadd.f32 %v4551_v45, %v4047_v44  ;;  %v2592_v47 = vpop.f32.mrb[5].mxu1  ;;  %v4974_v45 = vld [vmem:[%s5901_s5 + $0xe8] sm:$0xff]  }
 0x302   : > { %v2637_v48 = vadd.f32 %v4047_v44, %v2592_v47  ;;  %v4552_v49 = vpop.f32.mrb[6].mxu1  ;;  %v4976_v47 = vld [vmem:[%s5901_s5 + $0xf0] sm:$0xff]  }
 0x303   : > { %v2640_v51 = vadd.f32 %v4552_v49, %v4047_v44  ;;  %v2595_v52 = vpop.f32.mrb[7].mxu1  ;;  %v2647_v54 = vmax.f32 %v2639_v46, 0.0  ;;  %v4975_v46 = vld [vmem:[%s5901_s5 + $0x50] sm:$0xff]   ;;  %v4978_v49 = vld [vmem:[%s5901_s5 + $0xf8] sm:$0xff]  }
 0x304   : > { %v2638_v53 = vadd.f32 %v4047_v44, %v2595_v52  ;;  %v2645_v0 = vmax.f32 %v2637_v48, 0.0  ;;  %v4977_v48 = vld [vmem:[%s5901_s5 + $0x58] sm:$0xff]  }
 0x305   : > { %v2648_v55 = vmax.f32 %v2640_v51, 0.0 }
 0x306   : > { %v2646_v56 = vmax.f32 %v2638_v53, 0.0 }
 0x307   : > { %v2654_v58 = vmax.f32 %v2647_v54, %v2648_v55  ;;  %v4983_v55 = vld [vmem:[%s5901_s5 + $0x80] sm:$0xff]  }
 0x308   : > { %v2653_v59 = vmax.f32 %v2645_v0, %v2646_v56  ;;  %v4555_v3 = vpop.f32.mrb[8].mxu1 }
 0x309   : > { %2659 = vst.msk [vmem:[#allocation5 + $0x8] sm:$0xff] %vm2657_vm8, %v2654_v58  ;;  %v2643_v50 = vadd.f32 %v4555_v3, %v4047_v44  ;;  %v2608_v5 = vpop.f32.mrb[9].mxu1  ;;  %v4984_v58 = vld [vmem:[%s5901_s5 + $0x88] sm:$0xff]   ;;  %v4986_v3 = vld [vmem:[%s5901_s5 + $0x98] sm:$0xff]  }
 0x30a   : > { %2658 = vst.msk [vmem:[#allocation5] sm:$0xff] %vm2657_vm8, %v2653_v59  ;;  %v2641_v6 = vadd.f32 %v4047_v44, %v2608_v5  ;;  %v4556_v8 = vpop.f32.mrb[10].mxu1  ;;  %v4985_v59 = vld [vmem:[%s5901_s5 + $0x90] sm:$0xff]  }
 0x30b   : > { %v2644_v9 = vadd.f32 %v4556_v8, %v4047_v44  ;;  %v2611_v10 = vpop.f32.mrb[11].mxu1  ;;  %v2651_v12 = vmax.f32 %v2643_v50, 0.0 }
 0x30c   : > { %v2642_v11 = vadd.f32 %v4047_v44, %v2611_v10  ;;  %v2649_v14 = vmax.f32 %v2641_v6, 0.0  ;;  %v4973_v44 = vld [vmem:[%s5901_s5 + $0x48] sm:$0xff]   ;;  %v4989_v6 = vld [vmem:[%s5901_s5 + $0xc0] sm:$0xff]   ;;  %v4991_v10 = vld [vmem:[%s5901_s5 + $0xd0] sm:$0xff]  }
 0x30d   : > { %v2652_v13 = vmax.f32 %v2644_v9, 0.0  ;;  %v4990_v9 = vld [vmem:[%s5901_s5 + $0xc8] sm:$0xff]  }
 0x30e   : > { %v2650_v15 = vmax.f32 %v2642_v11, 0.0  ;;  %v4992_v11 = vld [vmem:[%s5901_s5 + $0xd8] sm:$0xff]  }
 0x30f   : > { %v2656_v16 = vmax.f32 %v2651_v12, %v2652_v13 }
 0x310   : > { %v2664_v17 = vld [vmem:[#allocation5 + $0x8] ss:$2 sm:$0xf]  ;;  %v2672_v18 = vld [vmem:[#allocation5 + $0x9] ss:$2 sm:$0xf]  ;;  %v2655_v19 = vmax.f32 %v2649_v14, %v2650_v15 }
 0x311   : > { %v2678_v20 = vmax.f32 %v2664_v17, %v2672_v18  ;;  %v2662_v22 = vld [vmem:[#allocation5] ss:$2 sm:$0xf]  ;;  %v2670_v23 = vld [vmem:[#allocation5 + $0x1] ss:$2 sm:$0xf] }
 0x312   : > { %2661 = vst.msk [vmem:[#allocation5 + $0x18] sm:$0xff] %vm2657_vm8, %v2656_v16  ;;  %v2677_v26 = vmax.f32 %v2662_v22, %v2670_v23  ;;  %2660 = vst.msk [vmem:[#allocation5 + $0x10] sm:$0xff] %vm2657_vm8, %v2655_v19  ;;  %v4995_v14 = vld [vmem:[%s5901_s5 + $0x100] sm:$0xff]   ;;  %v4996_v16 = vld [vmem:[%s5901_s5 + $0x108] sm:$0xff]  }
 0x313   : > { %2683 = vst.msk [vmem:[#allocation3 + $0x11] sm:$0xf] %vm2681_vm9, %v2678_v20  ;;  %v4997_v17 = vld [vmem:[%s5901_s5 + $0x110] sm:$0xff]   ;;  %v4998_v18 = vld [vmem:[%s5901_s5 + $0x118] sm:$0xff]   ;;  %v5001_v23 = vld [vmem:[%s5903_s7] sm:$0xff]  }
 0x314   : > { %2682 = vst.msk [vmem:[#allocation3 + $0x9] sm:$0xf] %vm2681_vm9, %v2677_v26  ;;  %v5002_v26 = vld [vmem:[%s5903_s7 + $0x8] sm:$0xff]  }
 0x319   : > { %v2668_v60 = vld [vmem:[#allocation5 + $0x18] ss:$2 sm:$0xf]  ;;  %v2676_v2 = vld [vmem:[#allocation5 + $0x19] ss:$2 sm:$0xf] }
 0x31a   : > { %v2680_v21 = vmax.f32 %v2668_v60, %v2676_v2  ;;  %v2666_v24 = vld [vmem:[#allocation5 + $0x10] ss:$2 sm:$0xf]  ;;  %v2674_v28 = vld [vmem:[#allocation5 + $0x11] ss:$2 sm:$0xf] }
 0x31b   : > { %v2679_v40 = vmax.f32 %v2666_v24, %v2674_v28  ;;  %v4955_v4 = vld [vmem:[#allocation3 + $0x1] ss:$8 sps:$4 sm:$0xff]   ;;  %v5003_v60 = vld [vmem:[%s5903_s7 + $0x10] sm:$0xff]   ;;  %v5004_v2 = vld [vmem:[%s5903_s7 + $0x18] sm:$0xff]  }
 0x31c   : > { %2685 = vst.msk [vmem:[#allocation3 + $0x21] sm:$0xf] %vm2681_vm9, %v2680_v21  ;;  %v4958_v61 = vld [vmem:[#allocation3 + $0x8] ss:$8 sps:$4 sm:$0xff]   ;;  %v5005_v21 = vld [vmem:[%s5903_s7 + $0x20] sm:$0xff]  }
 0x31d   : > { %2684 = vst.msk [vmem:[#allocation3 + $0x19] sm:$0xf] %vm2681_vm9, %v2679_v40  ;;  %v4967_v37 = vld [vmem:[#allocation3] ss:$8 sps:$4 sm:$0xff]   ;;  %v5007_v28 = vld [vmem:[%s5903_s7 + $0x30] sm:$0xff]   ;;  %v5008_v40 = vld [vmem:[%s5903_s7 + $0x38] sm:$0xff]  }
 0x31e   : > { %v4969_v1 = vld [vmem:[#allocation3 + $0xa] ss:$8 sps:$4 sm:$0xff]  }
 0x31f   : > { %v4979_v54 = vld [vmem:[#allocation3 + $0x2] ss:$8 sps:$4 sm:$0xff]  }
 0x320   : > { %v4987_v5 = vld [vmem:[#allocation3 + $0x9] ss:$8 sps:$4 sm:$0xff]  }
 0x321   : > { %v5006_v24 = vld [vmem:[%s5903_s7 + $0x28] sm:$0xff]  }
 0x323   : > { %v4982_v53 = vld [vmem:[#allocation3 + $0x21] ss:$8 sps:$4 sm:$0xff]  }
 0x324   : > { %v4956_v25 = vld [vmem:[#allocation3 + $0x11] ss:$8 sps:$4 sm:$0xff]   ;;  %v4994_v13 = vld [vmem:[#allocation3 + $0x20] ss:$8 sps:$4 sm:$0xff]  }
 0x325   : > { %v4959_v29 = vld [vmem:[#allocation3 + $0x18] ss:$8 sps:$4 sm:$0xff]   ;;  %v2720_v30 = vpack.c.bf16 %v4956_v25, %v4955_v4 }
 0x326   : > { %v2970_v31 = vpack.c.bf16 %v4959_v29, %v4958_v61  ;;  %v4968_v63 = vld [vmem:[#allocation3 + $0x10] ss:$8 sps:$4 sm:$0xff]   ;;  %v5000_v20 = vld [vmem:[#allocation3 + $0x22] ss:$8 sps:$4 sm:$0xff]  }
 0x327   : > { %4566 = vmatmul.mubr.msk.bf16.vlgmr.msra.gmra.mrb[12].mxu1 %vm2657_vm8, %v2720_v30  ;;  %v4970_v36 = vld [vmem:[#allocation3 + $0x1a] ss:$8 sps:$4 sm:$0xff]   ;;  %v2699_v39 = vpack.c.bf16 %v4968_v63, %v4967_v37 }
 0x328   : > { %4570 = vmatpush3.bf16.msra.mxu1 %v4957_v7  ;;  %4602 = vmatmul.mubr.msk.bf16.vlgmr.msra.gmra.mrb[32].mxu0 %vm2657_vm8, %v2970_v31  ;;  %v3154_v42 = vpack.c.bf16 %v4970_v36, %v4969_v1  ;;  %v4980_v51 = vld [vmem:[#allocation3 + $0x12] ss:$8 sps:$4 sm:$0xff]   ;;  %v5009_v4 = vld [vmem:[%s5905_s9] sm:$0xff]   ;;  %v5010_v7 = vld [vmem:[%s5905_s9 + $0x8] sm:$0xff]  }
 0x329   : > { %4618 = vmatpush3.bf16.msra.mxu0 %v4960_v62  ;;  %4571 = vmatprep.subr.bf16.mxu1 %v5077_v57  ;;  %v4981_v52 = vld [vmem:[#allocation3 + $0x11] ss:$8 sps:$4 sm:$0xff]   ;;  %v2878_v0 = vpack.c.bf16 %v4980_v51, %v4979_v54 }
 0x32a   : > { %4619 = vmatprep.subr.bf16.mxu0 %v5077_v57  ;;  %4577 = vmatprep.mubr.msk.bf16.mxu1 %vm5078_vm7, %v5077_v57  ;;  %v3339_v56 = vpack.c.bf16 %v4982_v53, %v4981_v52  ;;  %v4988_v50 = vld [vmem:[#allocation3 + $0x19] ss:$8 sps:$4 sm:$0xff]  }
 0x32b   : > { %4625 = vmatprep.mubr.msk.bf16.mxu0 %vm5078_vm7, %v5077_v57  ;;  %v3062_v8 = vpack.c.bf16 %v4988_v50, %v4987_v5  ;;  %v4993_v12 = vld [vmem:[#allocation3 + $0x10] ss:$8 sps:$4 sm:$0xff]  }
 0x32c   : > { %4572 = vmatpush3.bf16.msra.mxu1 %v4961_v32  ;;  %v3247_v15 = vpack.c.bf16 %v4994_v13, %v4993_v12  ;;  %v4999_v19 = vld [vmem:[#allocation3 + $0x12] ss:$8 sps:$4 sm:$0xff]  }
 0x32d   : > { %4620 = vmatpush3.bf16.msra.mxu0 %v4962_v33  ;;  %4573 = vmatprep.subr.bf16.mxu1 %v5077_v57  ;;  %v3431_v22 = vpack.c.bf16 %v5000_v20, %v4999_v19 }
 0x32e   : > { %4621 = vmatprep.subr.bf16.mxu0 %v5077_v57 }
 0x330   : > { %4574 = vmatpush3.bf16.msra.mxu1 %v4963_v34 }
 0x331   : > { %4622 = vmatpush3.bf16.msra.mxu0 %v4964_v35  ;;  %4575 = vmatprep.subr.bf16.mxu1 %v5077_v57 }
 0x332   : > { %4623 = vmatprep.subr.bf16.mxu0 %v5077_v57 }
 0x334   : > { %4576 = vmatpush3.bf16.msra.mxu1 %v4965_v43 }
 0x335   : > { %4624 = vmatpush3.bf16.msra.mxu0 %v4966_v27  ;;  %4581 = vmatprep.subr.bf16.mxu1 %v5077_v57 }
 0x336   : > { %4641 = vmatprep.subr.bf16.mxu0 %v5077_v57 }
 0x337   : > { %4578 = vmatmul.mubr.msk.bf16.vlgmr.msra.gmra.mrb[16].mxu1 %vm2657_vm8, %v2699_v39 }
 0x338   : > { %4626 = vmatmul.mubr.msk.bf16.vlgmr.msra.gmra.mrb[36].mxu0 %vm2657_vm8, %v3154_v42  ;;  %4582 = vmatpush3.bf16.msra.mxu1 %v4971_v38 }
 0x339   : > { %4642 = vmatpush3.bf16.msra.mxu0 %v4972_v41  ;;  %4583 = vmatprep.subr.bf16.mxu1 %v5077_v57 }
 0x33a   : > { %4643 = vmatprep.subr.bf16.mxu0 %v5077_v57  ;;  %4589 = vmatprep.mubr.msk.bf16.mxu1 %vm5078_vm7, %v5077_v57 }
 0x33b   : > { %4649 = vmatprep.mubr.msk.bf16.mxu0 %vm5078_vm7, %v5077_v57 }
 0x33c   : > { %4584 = vmatpush3.bf16.msra.mxu1 %v4973_v44 }
 0x33d   : > { %4644 = vmatpush3.bf16.msra.mxu0 %v4974_v45  ;;  %4585 = vmatprep.subr.bf16.mxu1 %v5077_v57 }
 0x33e   : > { %4645 = vmatprep.subr.bf16.mxu0 %v5077_v57 }
 0x340   : > { %4586 = vmatpush3.bf16.msra.mxu1 %v4975_v46 }
 0x341   : > { %4646 = vmatpush3.bf16.msra.mxu0 %v4976_v47  ;;  %4587 = vmatprep.subr.bf16.mxu1 %v5077_v57 }
 0x342   : > { %4647 = vmatprep.subr.bf16.mxu0 %v5077_v57 }
 0x344   : > { %4588 = vmatpush3.bf16.msra.mxu1 %v4977_v48 }
 0x345   : > { %4648 = vmatpush3.bf16.msra.mxu0 %v4978_v49  ;;  %4605 = vmatprep.subr.bf16.mxu1 %v5077_v57 }
 0x346   : > { %4665 = vmatprep.subr.bf16.mxu0 %v5077_v57 }
 0x347   : > { %4590 = vmatmul.mubr.msk.bf16.vlgmr.msra.gmra.mrb[20].mxu1 %vm2657_vm8, %v2878_v0 }
 0x348   : > { %4650 = vmatmul.mubr.msk.bf16.vlgmr.msra.gmra.mrb[40].mxu0 %vm2657_vm8, %v3339_v56  ;;  %4606 = vmatpush3.bf16.msra.mxu1 %v4983_v55 }
 0x349   : > { %4607 = vmatprep.subr.bf16.mxu1 %v5077_v57  ;;  %4613 = vmatprep.mubr.msk.bf16.mxu1 %vm5078_vm7, %v5077_v57 }
 0x34a   : > { %4681 = vmatprep.mubr.msk.bf16.mxu0 %vm5078_vm7, %v5077_v57  ;;  %4666 = vmatpush3.bf16.msra.mxu0 %v5001_v23 }
 0x34b   : > { %4667 = vmatprep.subr.bf16.mxu0 %v5077_v57 }
 0x34c   : > { %4608 = vmatpush3.bf16.msra.mxu1 %v4984_v58 }
 0x34d   : > { %4609 = vmatprep.subr.bf16.mxu1 %v5077_v57 }
 0x34e   : > { %4668 = vmatpush3.bf16.msra.mxu0 %v5002_v26 }
 0x34f   : > { %4669 = vmatprep.subr.bf16.mxu0 %v5077_v57 }
 0x350   : > { %4610 = vmatpush3.bf16.msra.mxu1 %v4985_v59 }
 0x351   : > { %4611 = vmatprep.subr.bf16.mxu1 %v5077_v57 }
 0x352   : > { %4670 = vmatpush3.bf16.msra.mxu0 %v5003_v60 }
 0x353   : > { %4671 = vmatprep.subr.bf16.mxu0 %v5077_v57 }
 0x354   : > { %4612 = vmatpush3.bf16.msra.mxu1 %v4986_v3 }
 0x355   : > { %4629 = vmatprep.subr.bf16.mxu1 %v5077_v57 }
 0x356   : > { %4672 = vmatpush3.bf16.msra.mxu0 %v5004_v2 }
 0x357   : > { %4614 = vmatmul.mubr.msk.bf16.vlgmr.msra.gmra.mrb[24].mxu1 %vm2657_vm8, %v3062_v8  ;;  %4673 = vmatprep.subr.bf16.mxu0 %v5077_v57 }
 0x358   : > { %4630 = vmatpush3.bf16.msra.mxu1 %v4989_v6  ;;  %4637 = vmatprep.mubr.msk.bf16.mxu1 %vm5078_vm7, %v5077_v57 }
 0x359   : > { %4631 = vmatprep.subr.bf16.mxu1 %v5077_v57 }
 0x35a   : > { %4674 = vmatpush3.bf16.msra.mxu0 %v5005_v21 }
 0x35b   : > { %4675 = vmatprep.subr.bf16.mxu0 %v5077_v57 }
 0x35c   : > { %4632 = vmatpush3.bf16.msra.mxu1 %v4990_v9 }
 0x35d   : > { %4633 = vmatprep.subr.bf16.mxu1 %v5077_v57 }
 0x35e   : > { %4676 = vmatpush3.bf16.msra.mxu0 %v5006_v24 }
 0x35f   : > { %4677 = vmatprep.subr.bf16.mxu0 %v5077_v57 }
 0x360   : > { %4634 = vmatpush3.bf16.msra.mxu1 %v4991_v10 }
 0x361   : > { %4635 = vmatprep.subr.bf16.mxu1 %v5077_v57 }
 0x362   : > { %4678 = vmatpush3.bf16.msra.mxu0 %v5007_v28 }
 0x363   : > { %4679 = vmatprep.subr.bf16.mxu0 %v5077_v57 }
 0x364   : > { %4636 = vmatpush3.bf16.msra.mxu1 %v4992_v11 }
 0x365   : > { %4653 = vmatprep.subr.bf16.mxu1 %v5077_v57 }
 0x366   : > { %4680 = vmatpush3.bf16.msra.mxu0 %v5008_v40 }
 0x367   : > { %4638 = vmatmul.mubr.msk.bf16.vlgmr.msra.gmra.mrb[28].mxu1 %vm2657_vm8, %v3247_v15  ;;  %v4157_v15 = vld [vmem:[%s5902_s6] ss:$0 sm:$0xff] }
 0x368   : > { %4654 = vmatpush3.bf16.msra.mxu1 %v4995_v14  ;;  %4661 = vmatprep.mubr.msk.bf16.mxu1 %vm5078_vm7, %v5077_v57 }
 0x369   : > { %4655 = vmatprep.subr.bf16.mxu1 %v5077_v57 }
 0x36c   : > { %4656 = vmatpush3.bf16.msra.mxu1 %v4996_v16 }
 0x36d   : > { %4657 = vmatprep.subr.bf16.mxu1 %v5077_v57 }
 0x370   : > { %4658 = vmatpush3.bf16.msra.mxu1 %v4997_v17 }
 0x371   : > { %4659 = vmatprep.subr.bf16.mxu1 %v5077_v57 }
 0x374   : > { %4660 = vmatpush3.bf16.msra.mxu1 %v4998_v18 }
 0x375   : > { %4685 = vmatprep.subr.bf16.mxu1 %v5077_v57 }
 0x377   : > { %4662 = vmatmul.mubr.msk.bf16.vlgmr.msra.gmra.mrb[32].mxu1 %vm2657_vm8, %v3431_v22 }
 0x378   : > { %4693 = vmatprep.mubr.msk.bf16.mxu1 %vm5078_vm7, %v5077_v57  ;;  %4686 = vmatpush3.bf16.msra.mxu1 %v5009_v4 }
 0x379   : > { %4687 = vmatprep.subr.bf16.mxu1 %v5077_v57 }
 0x37c   : > { %4688 = vmatpush3.bf16.msra.mxu1 %v5010_v7 }
 0x37d   : > { %4689 = vmatprep.subr.bf16.mxu1 %v5077_v57 }
 0x3fa   : > { %v2791_v25 = vpop.f32.mrb[12].mxu1 }
 0x3fb   : > { %v3041_v61 = vpop.f32.mrb[32].mxu0  ;;  %v4567_v29 = vpop.f32.mrb[13].mxu1 }
 0x3fc   : > { %v4603_v30 = vpop.f32.mrb[33].mxu0  ;;  %v2794_v62 = vpop.f32.mrb[14].mxu1 }
 0x3fd   : > { %v3044_v31 = vpop.f32.mrb[34].mxu0  ;;  %v4568_v32 = vpop.f32.mrb[15].mxu1  ;;  %v5011_v30 = vld [vmem:[%s5905_s9 + $0x10] sm:$0xff]  }
 0x3fe   : > { %v4604_v33 = vpop.f32.mrb[35].mxu0  ;;  %4690 = vmatpush3.bf16.msra.mxu1 %v5011_v30 }
 0x3ff   : > { %4691 = vmatprep.subr.bf16.mxu1 %v5077_v57 }
 0x40a   : > { %v2859_v34 = vpop.f32.mrb[16].mxu1 }
 0x40b   : > { %v2860_v35 = vadd.f32 %v2859_v34, %v2791_v25  ;;  %v3225_v43 = vpop.f32.mrb[36].mxu0  ;;  %v4579_v27 = vpop.f32.mrb[17].mxu1 }
 0x40c   : > { %v4627_v63 = vpop.f32.mrb[37].mxu0  ;;  %v2862_v36 = vpop.f32.mrb[18].mxu1 }
 0x40d   : > { %v2863_v37 = vadd.f32 %v2862_v36, %v2794_v62  ;;  %v3228_v1 = vpop.f32.mrb[38].mxu0  ;;  %v4580_v38 = vpop.f32.mrb[19].mxu1  ;;  %v5012_v62 = vld [vmem:[%s5905_s9 + $0x18] sm:$0xff]   ;;  %v3645_v36 = vld [vmem:[%s5906_s10] sm:$0x1] }
 0x40e   : > { %v4628_v39 = vpop.f32.mrb[39].mxu0  ;;  %4692 = vmatpush3.bf16.msra.mxu1 %v5012_v62 }
 0x41a   : > { %v2949_v41 = vpop.f32.mrb[20].mxu1 }
 0x41b   : > { %v2956_v42 = vadd.f32 %v2949_v41, %v2860_v35  ;;  %v3410_v44 = vpop.f32.mrb[40].mxu0  ;;  %v4591_v45 = vpop.f32.mrb[21].mxu1 }
 0x41c   : > { %v4651_v46 = vpop.f32.mrb[41].mxu0  ;;  %v2952_v47 = vpop.f32.mrb[22].mxu1 }
 0x41d   : > { %v2957_v48 = vadd.f32 %v2952_v47, %v2863_v37  ;;  %v3413_v49 = vpop.f32.mrb[42].mxu0  ;;  %v4592_v51 = vpop.f32.mrb[23].mxu1  ;;  %v3048_v52 = vadd.f32 %v3041_v61, %v2956_v42 }
 0x41e   : > { %v4652_v53 = vpop.f32.mrb[43].mxu0 }
 0x41f   : > { %v3049_v54 = vadd.f32 %v3044_v31, %v2957_v48  ;;  %v3546_v31 = vld [vmem:[%s5904_s8] sm:$0x1] }
 0x42a   : > { %v3133_v55 = vpop.f32.mrb[24].mxu1 }
 0x42b   : > { %v3140_v0 = vadd.f32 %v3133_v55, %v3048_v52  ;;  %v4615_v56 = vpop.f32.mrb[25].mxu1 }
 0x42c   : > { %v3136_v58 = vpop.f32.mrb[26].mxu1 }
 0x42d   : > { %v3141_v59 = vadd.f32 %v3136_v58, %v3049_v54  ;;  %v4616_v3 = vpop.f32.mrb[27].mxu1  ;;  %v3232_v50 = vadd.f32 %v3225_v43, %v3140_v0 }
 0x42f   : > { %v3233_v5 = vadd.f32 %v3228_v1, %v3141_v59 }
 0x43a   : > { %v3318_v6 = vpop.f32.mrb[28].mxu1 }
 0x43b   : > { %v3325_v8 = vadd.f32 %v3318_v6, %v3232_v50  ;;  %v4639_v9 = vpop.f32.mrb[29].mxu1 }
 0x43c   : > { %v3321_v10 = vpop.f32.mrb[30].mxu1 }
 0x43d   : > { %v3326_v11 = vadd.f32 %v3321_v10, %v3233_v5  ;;  %v4640_v12 = vpop.f32.mrb[31].mxu1  ;;  %v3417_v13 = vadd.f32 %v3410_v44, %v3325_v8 }
 0x43f   : > { %v3418_v14 = vadd.f32 %v3413_v49, %v3326_v11 }
 0x44a   : > { %v3502_v16 = vpop.f32.mrb[32].mxu1 }
 0x44b   : > { %v3509_v17 = vadd.f32 %v3502_v16, %v3417_v13  ;;  %v4663_v18 = vpop.f32.mrb[33].mxu1 }
 0x44c   : > { %v3505_v19 = vpop.f32.mrb[34].mxu1 }
 0x44d   : > { %v3517_v20 = vadd.f32 %v4157_v15, %v3509_v17  ;;  %v3510_v22 = vadd.f32 %v3505_v19, %v3418_v14  ;;  %v4664_v23 = vpop.f32.mrb[35].mxu1 }
 0x44f   : > { %v3518_v26 = vadd.f32 %v4157_v15, %v3510_v22  ;;  %v3519_v60 = vmax.f32 %v3517_v20, 0.0 }
 0x451   : > { %v3520_v2 = vmax.f32 %v3518_v26, 0.0 }
 0x453   : > { %v3521_v21 = vadd.f32 %v3520_v2, %v3519_v60 }
 0x455   : > { %v3522_v24 = vrot.slane %v3521_v21, 4 }
 0x457   : > { %v3523_v28 = vadd.f32 %v3522_v24, %v3521_v21 }
 0x459   : > { %v3524_v40 = vrot.slane %v3523_v28, 2 }
 0x45b   : > { %v3525_v4 = vadd.f32 %v3524_v40, %v3523_v28 }
 0x45d   : > { %v3526_v7 = vrot.slane %v3525_v4, 1 }
 0x45f   : > { %v3527_v25 = vadd.f32 %v3526_v7, %v3525_v4 }
 0x461   : > { %v3528_v61 = vmul.f32 0.0625, %v3527_v25 }
 0x463   : > { %v3529_v29 = vpack.c.bf16 %v3528_v61, %v3528_v61 }
 0x465   : > { %4682 = vmatmul.mubr.bf16.vlgmr.msra.gmra.mrb[44].mxu0 %v3529_v29 }
 0x538   : > { %v3629_v32 = vpop.f32.mrb[44].mxu0 }
 0x539   : > { %v3630_v33 = vadd.f32 %v3629_v32, %v3546_v31  ;;  %v4683_v34 = vpop.f32.mrb[45].mxu0 }
 0x53a   : > { %v3632_v35 = vpop.f32.mrb[46].mxu0 }
 0x53b   : > { %v3635_v43 = vmax.f32 %v3630_v33, 0.0  ;;  %v4684_v27 = vpop.f32.mrb[47].mxu0 }
 0x53d   : > { %v3636_v63 = vpack.c.bf16 %v3635_v43, %v3635_v43 }
 0x53f   : > { %4694 = vmatmul.mubr.msk.bf16.vlgmr.msra.gmra.mrb[36].mxu1 %vm2657_vm8, %v3636_v63 }
 0x612   : > { %v3707_v57 = vpop.f32.mrb[36].mxu1 }
 0x613   : > { %v3708_v37 = vadd.f32 %v3707_v57, %v3645_v36  ;;  %v4695_v1 = vpop.f32.mrb[37].mxu1 }
 0x614   : > { %v3710_v38 = vpop.f32.mrb[38].mxu1 }
 0x615   : > { %v4696_v39 = vpop.f32.mrb[39].mxu1  ;;  %3714 = vst.msk [vmem:[%s378_s30] sm:$0x1] %vm3713_vm10, %v3708_v37 }
 0x616   : > { %5026 = shalt.err (!%p5023_p3)
}
 0x617   : > { %s5027_s22 = scalar_lea.hbm %s5854_s15, 16  ;;  %s5031_s14 = scalar_lea.hbm %s5907_s11, 32 }
 0x618   : > { %p5028_p4 = scmp.ne.s32.totalorder %s5854_s15, %s5027_s22  ;;  %p5032_p9 = scmp.lt.u32.totalorder %s5854_s15, %s5907_s11 }
 0x619   : > { %p5033_p10 = scmp.lt.u32.totalorder %s5031_s14, %s5027_s22  ;;  %p5035_p12 = scmp.lt.u32.totalorder %s5027_s22, %s5854_s15 }
 0x61a   : > { %p5029_p7 = pnand %p5028_p4, %p5178_p5 }
 0x61b   : > { %p5034_p11 = por %p5033_p10, %p5032_p9 }
 0x61c   : > { %p5030_p8 = pneg %p5029_p7 }
 0x61d   : > { %p5036_p13 = por %p5035_p12, %p5034_p11 }
 0x61f   : > { %p5037_p0 = pnand %p5036_p13, %p5030_p8 }
 0x621   : > { %5040 = shalt.err (!%p5037_p0)
}
 0x622   : > { %4834 = dma.vmem_to_hbm [thread:$0]  (%p5178_p5), %s5856_s12, 16, %s5854_s15, %s3716_s21  }
 0x623 PF: > { %p4840_p1 = scmp.ge.s32.totalorder %s5075_s20, 2  ;;  %s3740_s16 = sand.u32 1, %s5063_s17  }
 0x624   : > { %s3741_s13 = scalar_lea.sflag [#allocation7], %s3740_s16 }
 0x625   : > { %p4837_p2 = pnand %p4840_p1, %p5182_p6 }
 0x627   : > { %5058 = dma.done.wait (!%p4837_p2), %s3741_s13, 16  }
 0x628   : > { %5060 = vsyncadd (!%p4837_p2), %s3741_s13, 4294967280  ;;  %p21_p3 = scmp.ge.s32.totalorder %s5165_s23, 4   ;;  %s5910_s17 = smov %s5067_s18 }
 0x629   : > { %s5911_s18 = smov %s5071_s19  ;;  %s5912_s19 = smov %s5176_s26 }
 0x62a   : > { %s5913_s20 = smov %s5165_s23  ;;  %23 = sbr.rel (!%p21_p3) target bundleno = 3 (0x3), region = 147 }
 0x631   :  { %3745 = vsyncpa [#allocation7], 1 }
 0x632   :  { %3747 = vsyncpa [#allocation7 + $0x1], 1 }

</bundles_post_ra>
